<compile_context>
chip_gen: v7x
topology: tpu7x:2x2x1
jax: 0.10.0
libtpu: 0.0.40
codegen_flags: <defaults>
</compile_context>

<pallas_src>
import functools

import numpy as np
import jax
import jax.numpy as jnp
from jax import lax
from jax.experimental import pallas as pl
from jax.experimental.pallas import tpu as pltpu


def _choose_s_blk(S, H, max_sh=512):
    """Pick how many series to pack per grid step (divisor of S)."""
    divisors = [d for d in range(1, S + 1) if S % d == 0]
    cands = [d for d in divisors if d * H <= max_sh]
    if not cands:
        return 1
    aligned = [d for d in cands if (d * H) % 128 == 0]
    return max(aligned) if aligned else max(cands)


def _pack_params(params, S_blk):
    """Pack per-network PyTorch-layout weights into gate-major, block-diagonal
    operands consumed by the kernel."""
    wih, whh, bih, bhh, wlin, blin = params
    S, fourH, P = wih.shape
    H = fourH // 4
    NB = S // S_blk
    SH = S_blk * H

    # W_ih^T packed: (NB, P, 4*SH); column index = g*SH + s*H + k.
    wih_t = jnp.transpose(wih, (0, 2, 1)).reshape(NB, S_blk, P, 4, H)
    wih_p = jnp.transpose(wih_t, (0, 2, 3, 1, 4)).reshape(NB, P, 4 * SH)

    # Combined bias b_ih + b_hh, same gate-major packing: (NB, 1, 4*SH).
    b = (bih + bhh).reshape(NB, S_blk, 4, H)
    b = jnp.transpose(b, (0, 2, 1, 3)).reshape(NB, 1, 4 * SH)

    # Block-diagonal W_hh^T: (NB, SH, 4*SH); row s*H+j, col g*SH+s'*H+k.
    whh_t = jnp.transpose(whh, (0, 2, 1)).reshape(NB, S_blk, H, 4, H)
    eye = jnp.eye(S_blk, dtype=whh_t.dtype)
    whh_bd = jnp.einsum('nsjgk,st->nsjgtk', whh_t, eye).reshape(NB, SH, 4 * SH)

    # Block-diagonal Conv1d(H,1,1) weight: (NB, SH, S_blk) and bias (NB, 1, S_blk).
    wlin_r = wlin.reshape(NB, S_blk, H)
    wlin_bd = jnp.einsum('nsk,st->nskt', wlin_r, eye).reshape(NB, SH, S_blk)
    blin_p = blin.reshape(NB, 1, S_blk)

    return wih_p, whh_bd, b, wlin_bd, blin_p


def _clstm_kernel(x_ref, wih_ref, whh_ref, bias_ref, wlin_ref, blin_ref,
                  pred_ref, hfin_ref, cfin_ref, gx_scr, h_all,
                  *, T, B_pad, SH):
    """One grid step == one block of S_blk independent LSTM networks.

    x_ref    : (T*B_pad, P)      time-major input, batch padded to sublane mult.
    wih_ref  : (1, P, 4*SH)      packed input->gates weight (gate-major cols)
    whh_ref  : (1, SH, 4*SH)     block-diagonal hidden->gates weight
    bias_ref : (1, 1, 4*SH)      b_ih + b_hh (precombined)
    wlin_ref : (1, SH, S_blk)    block-diagonal Conv1d(H,1,1) weight
    blin_ref : (1, 1, S_blk)     Conv1d bias
    pred_ref : (1, T*B_pad, S_blk)   predictions for every timestep/batch row
    hfin_ref : (1, B_pad, SH)    final hidden state (packed)
    cfin_ref : (1, B_pad, SH)    final cell state (packed)
    gx_scr   : (T*B_pad, 4*SH)   f32 scratch: input projection for all t
    h_all    : (T*B_pad, SH)     f32 scratch: hidden state for all t
    """
    whh = whh_ref[0]

    # Hoisted input projection: one MXU matmul for every timestep at once,
    # bias folded in -> removes half the matmuls (and the bias add) from the
    # serial per-timestep dependency chain.
    gx_scr[...] = (jnp.dot(x_ref[...], wih_ref[0],
                           preferred_element_type=jnp.float32) + bias_ref[0])

    def step(t, carry):
        h, c = carry
        row = t * B_pad
        if not isinstance(row, int):
            row = pl.multiple_of(row, B_pad)          # tile-aligned dynamic slice
        gates = gx_scr[pl.ds(row, B_pad), :] + jnp.dot(
            h, whh, preferred_element_type=jnp.float32)       # (B_pad, 4*SH)
        # PyTorch gate order i, f, g, o; each slice is lane-aligned (SH % 128 == 0).
        i_g = jax.nn.sigmoid(gates[:, 0 * SH:1 * SH])
        f_g = jax.nn.sigmoid(gates[:, 1 * SH:2 * SH])
        g_g = jnp.tanh(gates[:, 2 * SH:3 * SH])
        o_g = jax.nn.sigmoid(gates[:, 3 * SH:4 * SH])
        c = f_g * c + i_g * g_g
        h = o_g * jnp.tanh(c)
        h_all[pl.ds(row, B_pad), :] = h               # off the critical recurrence path
        return (h, c)

    h0 = jnp.zeros((B_pad, SH), jnp.float32)
    c0 = jnp.zeros((B_pad, SH), jnp.float32)
    if T <= 64:
        # Full static unroll: lets the scheduler overlap independent work
        # (EUP/VPU/MXU) across adjacent timesteps.
        h, c = h0, c0
        for t in range(T):
            h, c = step(t, (h, c))
    else:
        h, c = lax.fori_loop(0, T, step, (h0, c0), unroll=8)

    # Hoisted Conv1d(H,1,1): one matmul over all timesteps and one dense block
    # store instead of T narrow masked per-timestep stores.
    pred_ref[0] = (jnp.dot(h_all[...], wlin_ref[0],
                           preferred_element_type=jnp.float32) + blin_ref[0])
    hfin_ref[0] = h
    cfin_ref[0] = c


@functools.partial(jax.jit, static_argnames=("hidden",))
def clstm_forward(X, params, *, hidden):
    """cLSTM.forward.  X: (batch, T, p) float32.  Returns (pred, (h_fin, c_fin))
    with pred (batch, T, p) and h_fin/c_fin stacked as (p, batch, hidden)."""
    wih, whh, bih, bhh, wlin, blin = params
    B, T, P = X.shape
    S = wih.shape[0]                       # num_series == p
    H = hidden
    S_blk = _choose_s_blk(S, H)
    NB = S // S_blk
    SH = S_blk * H
    B_pad = ((B + 7) // 8) * 8             # pad batch to a sublane multiple

    wih_p, whh_bd, bias_p, wlin_bd, blin_p = _pack_params(params, S_blk)

    x_tm = jnp.transpose(X, (1, 0, 2)).astype(jnp.float32)         # (T, B, P)
    x_tm = jnp.pad(x_tm, ((0, 0), (0, B_pad - B), (0, 0)))         # (T, B_pad, P)
    x_flat = x_tm.reshape(T * B_pad, P)                            # time-major rows

    kernel = functools.partial(_clstm_kernel, T=T, B_pad=B_pad, SH=SH)

    grid_spec = pltpu.PrefetchScalarGridSpec(
        num_scalar_prefetch=0,
        grid=(NB,),
        in_specs=[
            pl.BlockSpec((T * B_pad, P), lambda i: (0, 0)),          # X (shared)
            pl.BlockSpec((1, P, 4 * SH), lambda i: (i, 0, 0)),       # packed W_ih^T
            pl.BlockSpec((1, SH, 4 * SH), lambda i: (i, 0, 0)),      # block-diag W_hh^T
            pl.BlockSpec((1, 1, 4 * SH), lambda i: (i, 0, 0)),       # b_ih + b_hh
            pl.BlockSpec((1, SH, S_blk), lambda i: (i, 0, 0)),       # block-diag conv w
            pl.BlockSpec((1, 1, S_blk), lambda i: (i, 0, 0)),        # conv bias
        ],
        out_specs=[
            pl.BlockSpec((1, T * B_pad, S_blk), lambda i: (i, 0, 0)),  # pred
            pl.BlockSpec((1, B_pad, SH), lambda i: (i, 0, 0)),         # h_T (packed)
            pl.BlockSpec((1, B_pad, SH), lambda i: (i, 0, 0)),         # c_T (packed)
        ],
        scratch_shapes=[
            pltpu.VMEM((T * B_pad, 4 * SH), jnp.float32),   # gates_x for all t
            pltpu.VMEM((T * B_pad, SH), jnp.float32),       # h for all t
        ],
    )

    pred_k, h_k, c_k = pl.pallas_call(
        kernel,
        grid_spec=grid_spec,
        out_shape=(
            jax.ShapeDtypeStruct((NB, T * B_pad, S_blk), jnp.float32),
            jax.ShapeDtypeStruct((NB, B_pad, SH), jnp.float32),
            jax.ShapeDtypeStruct((NB, B_pad, SH), jnp.float32),
        ),
        compiler_params=pltpu.CompilerParams(
            dimension_semantics=("parallel",),      # series blocks are independent
            vmem_limit_bytes=32 * 1024 * 1024),
    )(x_flat, wih_p, whh_bd, bias_p, wlin_bd, blin_p)

    # Unpack: rows are t-major / b-minor, columns are network-within-block.
    pred = pred_k.reshape(NB, T, B_pad, S_blk)[:, :, :B, :]
    pred = jnp.transpose(pred, (2, 1, 0, 3)).reshape(B, T, S)        # (batch, T, p)

    h_fin = h_k.reshape(NB, B_pad, S_blk, H)[:, :B]
    h_fin = jnp.transpose(h_fin, (0, 2, 1, 3)).reshape(S, B, H)
    c_fin = c_k.reshape(NB, B_pad, S_blk, H)[:, :B]
    c_fin = jnp.transpose(c_fin, (0, 2, 1, 3)).reshape(S, B, H)
    return pred, (h_fin, c_fin)


def init_clstm_params(key, num_series, hidden):
    """Deterministic PyTorch-style uniform(-1/sqrt(H), 1/sqrt(H)) init."""
    S, P, H = num_series, num_series, hidden
    k = 1.0 / np.sqrt(H)
    ks = jax.random.split(key, 6)
    u = lambda kk, shape: jax.random.uniform(kk, shape, jnp.float32, -k, k)
    wih = u(ks[0], (S, 4 * H, P))          # per-network weight_ih_l0
    whh = u(ks[1], (S, 4 * H, H))          # per-network weight_hh_l0
    bih = u(ks[2], (S, 4 * H))
    bhh = u(ks[3], (S, 4 * H))
    wlin = u(ks[4], (S, H))                # Conv1d(H,1,1).weight, squeezed
    blin = u(ks[5], (S,))                  # Conv1d bias
    return wih, whh, bih, bhh, wlin, blin


def clstm_reference(X, params, hidden):
    """Pure-JAX reference mirroring the PyTorch forward (per-network LSTM + conv)."""
    wih, whh, bih, bhh, wlin, blin = params
    B, T, P = X.shape
    S = wih.shape[0]
    H = hidden
    x_tm = jnp.transpose(X, (1, 0, 2))     # (T, B, P)
    preds, hs, cs = [], [], []
    for s in range(S):
        wih_t, whh_t = wih[s].T, whh[s].T
        b = bih[s] + bhh[s]

        def step(carry, x_t, wih_t=wih_t, whh_t=whh_t, b=b):
            h, c = carry
            g = x_t @ wih_t + h @ whh_t + b
            i = jax.nn.sigmoid(g[:, :H])
            f = jax.nn.sigmoid(g[:, H:2 * H])
            gg = jnp.tanh(g[:, 2 * H:3 * H])
            o = jax.nn.sigmoid(g[:, 3 * H:])
            c = f * c + i * gg
            h = o * jnp.tanh(c)
            return (h, c), h

        init = (jnp.zeros((B, H), jnp.float32), jnp.zeros((B, H), jnp.float32))
        (h, c), h_seq = lax.scan(step, init, x_tm)                 # h_seq (T, B, H)
        y = jnp.einsum('tbh,h->tb', h_seq, wlin[s]) + blin[s]      # (T, B)
        preds.append(y.T[..., None])                               # (B, T, 1)
        hs.append(h)
        cs.append(c)
    return jnp.concatenate(preds, axis=2), jnp.stack(hs), jnp.stack(cs)


if __name__ == "__main__":
    batch, T, num_chans, hidden = 2, 8, 4, 32
    num_series = num_chans                 # wavelet_level=None branch

    key = jax.random.PRNGKey(0)
    kx, kp = jax.random.split(key)
    X = jax.random.normal(kx, (batch, T, num_series), dtype=jnp.float32)
    params = init_clstm_params(kp, num_series, hidden)

    pred, (h_fin, c_fin) = clstm_forward(X, params, hidden=hidden)
    pred = jax.block_until_ready(pred)
    h_fin = jax.block_until_ready(h_fin)
    c_fin = jax.block_until_ready(c_fin)

    assert pred.shape == (batch, T, num_series)
    assert h_fin.shape == (num_series, batch, hidden)
    assert c_fin.shape == (num_series, batch, hidden)

    pred_ref, h_ref, c_ref = clstm_reference(X, params, hidden)
    np.testing.assert_allclose(np.asarray(pred), np.asarray(pred_ref), rtol=2e-3, atol=2e-3)
    np.testing.assert_allclose(np.asarray(h_fin), np.asarray(h_ref), rtol=2e-3, atol=2e-3)
    np.testing.assert_allclose(np.asarray(c_fin), np.asarray(c_ref), rtol=2e-3, atol=2e-3)

    # TODO(synk): PyTorch returns `hidden` as a tuple of per-network (h_n, c_n)
    # each shaped (1, batch, hidden); here they are returned stacked as
    # (num_series, batch, hidden) arrays (equivalent data, different container).
    print("KERNEL_OK")
</pallas_src>

<mosaic_0001>
module attributes {stable_mosaic.version = 11 : i64} {
  func.func @_clstm_kernel(%arg0: i32, %arg1: memref<64x4xf32, #tpu.memory_space<vmem>>, %arg2: memref<1x4x512xf32, #tpu.memory_space<vmem>>, %arg3: memref<1x128x512xf32, #tpu.memory_space<vmem>>, %arg4: memref<1x1x512xf32, #tpu.memory_space<vmem>>, %arg5: memref<1x128x4xf32, #tpu.memory_space<vmem>>, %arg6: memref<1x1x4xf32, #tpu.memory_space<vmem>>, %arg7: memref<1x64x4xf32, #tpu.memory_space<vmem>>, %arg8: memref<1x8x128xf32, #tpu.memory_space<vmem>>, %arg9: memref<1x8x128xf32, #tpu.memory_space<vmem>>, %arg10: memref<64x512xf32, #tpu.memory_space<vmem>>, %arg11: memref<64x128xf32, #tpu.memory_space<vmem>>) attributes {dimension_semantics = [#tpu.dimension_semantics<parallel>], iteration_bounds = array<i64: 1>, scalar_prefetch = 0 : i64, scratch_operands = 2 : i64, tpu.core_type = #tpu.core_type<tc>, window_params = [{pipeline_mode = #tpu.pipeline_mode<synchronous>, transform_indices = @transform_0, window_bounds = array<i64: 64, 4>}, {transform_indices = @transform_1, window_bounds = array<i64: 1, 4, 512>}, {transform_indices = @transform_2, window_bounds = array<i64: 1, 128, 512>}, {transform_indices = @transform_3, window_bounds = array<i64: 1, 1, 512>}, {transform_indices = @transform_4, window_bounds = array<i64: 1, 128, 4>}, {transform_indices = @transform_5, window_bounds = array<i64: 1, 1, 4>}, {transform_indices = @transform_6, window_bounds = array<i64: 1, 64, 4>}, {transform_indices = @transform_7, window_bounds = array<i64: 1, 8, 128>}, {transform_indices = @transform_8, window_bounds = array<i64: 1, 8, 128>}]} {
    %c0 = arith.constant 0 : index
    %c0_0 = arith.constant 0 : index
    %c0_1 = arith.constant 0 : index
    %0 = vector.load %arg3[%c0, %c0_0, %c0_1] : memref<1x128x512xf32, #tpu.memory_space<vmem>>, vector<1x128x512xf32>
    %1 = vector.shape_cast %0 : vector<1x128x512xf32> to vector<128x512xf32>
    %c0_2 = arith.constant 0 : index
    %c0_3 = arith.constant 0 : index
    %2 = vector.load %arg1[%c0_2, %c0_3] : memref<64x4xf32, #tpu.memory_space<vmem>>, vector<64x4xf32>
    %c0_4 = arith.constant 0 : index
    %c0_5 = arith.constant 0 : index
    %c0_6 = arith.constant 0 : index
    %3 = vector.load %arg2[%c0_4, %c0_5, %c0_6] : memref<1x4x512xf32, #tpu.memory_space<vmem>>, vector<1x4x512xf32>
    %4 = vector.shape_cast %3 : vector<1x4x512xf32> to vector<4x512xf32>
    %cst = arith.constant dense<0.000000e+00> : vector<64x512xf32>
    %5 = tpu.matmul %2, %4, %cst {dimension_numbers = #tpu.dot_dimension_numbers<[1], [0], [0], [1], [0, 0, 1, 1], [], []>} : vector<64x4xf32>, vector<4x512xf32>, vector<64x512xf32> -> vector<64x512xf32>
    %c0_7 = arith.constant 0 : index
    %c0_8 = arith.constant 0 : index
    %c0_9 = arith.constant 0 : index
    %6 = vector.load %arg4[%c0_7, %c0_8, %c0_9] : memref<1x1x512xf32, #tpu.memory_space<vmem>>, vector<1x1x512xf32>
    %7 = vector.shape_cast %6 : vector<1x1x512xf32> to vector<1x512xf32>
    %8 = vector.broadcast %7 : vector<1x512xf32> to vector<64x512xf32>
    %9 = arith.addf %5, %8 : vector<64x512xf32>
    %c0_10 = arith.constant 0 : index
    %c0_11 = arith.constant 0 : index
    %10 = vector.load %arg10[%c0_10, %c0_11] : memref<64x512xf32, #tpu.memory_space<vmem>>, vector<64x512xf32>
    tpu.vector_store %arg10[%c0_10, %c0_11], %9 {strides = array<i32>} : memref<64x512xf32, #tpu.memory_space<vmem>>, vector<64x512xf32>,
    %cst_12 = arith.constant 0.000000e+00 : f32
    %11 = vector.broadcast %cst_12 : f32 to vector<8x128xf32>
    %cst_13 = arith.constant 0.000000e+00 : f32
    %12 = vector.broadcast %cst_13 : f32 to vector<8x128xf32>
    %c0_14 = arith.constant 0 : index
    %c0_15 = arith.constant 0 : index
    %13 = vector.load %arg10[%c0_14, %c0_15] : memref<64x512xf32, #tpu.memory_space<vmem>>, vector<8x512xf32>
    %cst_16 = arith.constant dense<0.000000e+00> : vector<8x512xf32>
    %14 = tpu.matmul %11, %1, %cst_16 {dimension_numbers = #tpu.dot_dimension_numbers<[1], [0], [0], [1], [0, 0, 1, 1], [], []>} : vector<8x128xf32>, vector<128x512xf32>, vector<8x512xf32> -> vector<8x512xf32>
    %15 = arith.addf %13, %14 : vector<8x512xf32>
    %16 = vector.extract_strided_slice %15 {offsets = [0, 0], sizes = [8, 128], strides = [1, 1]} : vector<8x512xf32> to vector<8x128xf32>
    %17 = arith.negf %16 : vector<8x128xf32>
    %18 = math.exp %17 : vector<8x128xf32>
    %cst_17 = arith.constant 1.000000e+00 : f32
    %19 = vector.broadcast %cst_17 : f32 to vector<8x128xf32>
    %20 = arith.addf %19, %18 : vector<8x128xf32>
    %21 = arith.divf %19, %20 : vector<8x128xf32>
    %22 = vector.extract_strided_slice %15 {offsets = [0, 128], sizes = [8, 128], strides = [1, 1]} : vector<8x512xf32> to vector<8x128xf32>
    %23 = arith.negf %22 : vector<8x128xf32>
    %24 = math.exp %23 : vector<8x128xf32>
    %cst_18 = arith.constant 1.000000e+00 : f32
    %25 = vector.broadcast %cst_18 : f32 to vector<8x128xf32>
    %26 = arith.addf %25, %24 : vector<8x128xf32>
    %27 = arith.divf %25, %26 : vector<8x128xf32>
    %28 = vector.extract_strided_slice %15 {offsets = [0, 256], sizes = [8, 128], strides = [1, 1]} : vector<8x512xf32> to vector<8x128xf32>
    %29 = math.tanh %28 : vector<8x128xf32>
    %30 = vector.extract_strided_slice %15 {offsets = [0, 384], sizes = [8, 128], strides = [1, 1]} : vector<8x512xf32> to vector<8x128xf32>
    %31 = arith.negf %30 : vector<8x128xf32>
    %32 = math.exp %31 : vector<8x128xf32>
    %cst_19 = arith.constant 1.000000e+00 : f32
    %33 = vector.broadcast %cst_19 : f32 to vector<8x128xf32>
    %34 = arith.addf %33, %32 : vector<8x128xf32>
    %35 = arith.divf %33, %34 : vector<8x128xf32>
    %36 = arith.mulf %27, %12 : vector<8x128xf32>
    %37 = arith.mulf %21, %29 : vector<8x128xf32>
    %38 = arith.addf %36, %37 : vector<8x128xf32>
    %39 = math.tanh %38 : vector<8x128xf32>
    %40 = arith.mulf %35, %39 : vector<8x128xf32>
    %c0_20 = arith.constant 0 : index
    %c0_21 = arith.constant 0 : index
    %41 = vector.load %arg11[%c0_20, %c0_21] : memref<64x128xf32, #tpu.memory_space<vmem>>, vector<8x128xf32>
    tpu.vector_store %arg11[%c0_20, %c0_21], %40 {strides = array<i32>} : memref<64x128xf32, #tpu.memory_space<vmem>>, vector<8x128xf32>,
    %c8 = arith.constant 8 : index
    %c0_22 = arith.constant 0 : index
    %42 = vector.load %arg10[%c8, %c0_22] : memref<64x512xf32, #tpu.memory_space<vmem>>, vector<8x512xf32>
    %cst_23 = arith.constant dense<0.000000e+00> : vector<8x512xf32>
    %43 = tpu.matmul %40, %1, %cst_23 {dimension_numbers = #tpu.dot_dimension_numbers<[1], [0], [0], [1], [0, 0, 1, 1], [], []>} : vector<8x128xf32>, vector<128x512xf32>, vector<8x512xf32> -> vector<8x512xf32>
    %44 = arith.addf %42, %43 : vector<8x512xf32>
    %45 = vector.extract_strided_slice %44 {offsets = [0, 0], sizes = [8, 128], strides = [1, 1]} : vector<8x512xf32> to vector<8x128xf32>
    %46 = arith.negf %45 : vector<8x128xf32>
    %47 = math.exp %46 : vector<8x128xf32>
    %cst_24 = arith.constant 1.000000e+00 : f32
    %48 = vector.broadcast %cst_24 : f32 to vector<8x128xf32>
    %49 = arith.addf %48, %47 : vector<8x128xf32>
    %50 = arith.divf %48, %49 : vector<8x128xf32>
    %51 = vector.extract_strided_slice %44 {offsets = [0, 128], sizes = [8, 128], strides = [1, 1]} : vector<8x512xf32> to vector<8x128xf32>
    %52 = arith.negf %51 : vector<8x128xf32>
    %53 = math.exp %52 : vector<8x128xf32>
    %cst_25 = arith.constant 1.000000e+00 : f32
    %54 = vector.broadcast %cst_25 : f32 to vector<8x128xf32>
    %55 = arith.addf %54, %53 : vector<8x128xf32>
    %56 = arith.divf %54, %55 : vector<8x128xf32>
    %57 = vector.extract_strided_slice %44 {offsets = [0, 256], sizes = [8, 128], strides = [1, 1]} : vector<8x512xf32> to vector<8x128xf32>
    %58 = math.tanh %57 : vector<8x128xf32>
    %59 = vector.extract_strided_slice %44 {offsets = [0, 384], sizes = [8, 128], strides = [1, 1]} : vector<8x512xf32> to vector<8x128xf32>
    %60 = arith.negf %59 : vector<8x128xf32>
    %61 = math.exp %60 : vector<8x128xf32>
    %cst_26 = arith.constant 1.000000e+00 : f32
    %62 = vector.broadcast %cst_26 : f32 to vector<8x128xf32>
    %63 = arith.addf %62, %61 : vector<8x128xf32>
    %64 = arith.divf %62, %63 : vector<8x128xf32>
    %65 = arith.mulf %56, %38 : vector<8x128xf32>
    %66 = arith.mulf %50, %58 : vector<8x128xf32>
    %67 = arith.addf %65, %66 : vector<8x128xf32>
    %68 = math.tanh %67 : vector<8x128xf32>
    %69 = arith.mulf %64, %68 : vector<8x128xf32>
    %c8_27 = arith.constant 8 : index
    %c0_28 = arith.constant 0 : index
    %70 = vector.load %arg11[%c8_27, %c0_28] : memref<64x128xf32, #tpu.memory_space<vmem>>, vector<8x128xf32>
    tpu.vector_store %arg11[%c8_27, %c0_28], %69 {strides = array<i32>} : memref<64x128xf32, #tpu.memory_space<vmem>>, vector<8x128xf32>,
    %c16 = arith.constant 16 : index
    %c0_29 = arith.constant 0 : index
    %71 = vector.load %arg10[%c16, %c0_29] : memref<64x512xf32, #tpu.memory_space<vmem>>, vector<8x512xf32>
    %cst_30 = arith.constant dense<0.000000e+00> : vector<8x512xf32>
    %72 = tpu.matmul %69, %1, %cst_30 {dimension_numbers = #tpu.dot_dimension_numbers<[1], [0], [0], [1], [0, 0, 1, 1], [], []>} : vector<8x128xf32>, vector<128x512xf32>, vector<8x512xf32> -> vector<8x512xf32>
    %73 = arith.addf %71, %72 : vector<8x512xf32>
    %74 = vector.extract_strided_slice %73 {offsets = [0, 0], sizes = [8, 128], strides = [1, 1]} : vector<8x512xf32> to vector<8x128xf32>
    %75 = arith.negf %74 : vector<8x128xf32>
    %76 = math.exp %75 : vector<8x128xf32>
    %cst_31 = arith.constant 1.000000e+00 : f32
    %77 = vector.broadcast %cst_31 : f32 to vector<8x128xf32>
    %78 = arith.addf %77, %76 : vector<8x128xf32>
    %79 = arith.divf %77, %78 : vector<8x128xf32>
    %80 = vector.extract_strided_slice %73 {offsets = [0, 128], sizes = [8, 128], strides = [1, 1]} : vector<8x512xf32> to vector<8x128xf32>
    %81 = arith.negf %80 : vector<8x128xf32>
    %82 = math.exp %81 : vector<8x128xf32>
    %cst_32 = arith.constant 1.000000e+00 : f32
    %83 = vector.broadcast %cst_32 : f32 to vector<8x128xf32>
    %84 = arith.addf %83, %82 : vector<8x128xf32>
    %85 = arith.divf %83, %84 : vector<8x128xf32>
    %86 = vector.extract_strided_slice %73 {offsets = [0, 256], sizes = [8, 128], strides = [1, 1]} : vector<8x512xf32> to vector<8x128xf32>
    %87 = math.tanh %86 : vector<8x128xf32>
    %88 = vector.extract_strided_slice %73 {offsets = [0, 384], sizes = [8, 128], strides = [1, 1]} : vector<8x512xf32> to vector<8x128xf32>
    %89 = arith.negf %88 : vector<8x128xf32>
    %90 = math.exp %89 : vector<8x128xf32>
    %cst_33 = arith.constant 1.000000e+00 : f32
    %91 = vector.broadcast %cst_33 : f32 to vector<8x128xf32>
    %92 = arith.addf %91, %90 : vector<8x128xf32>
    %93 = arith.divf %91, %92 : vector<8x128xf32>
    %94 = arith.mulf %85, %67 : vector<8x128xf32>
    %95 = arith.mulf %79, %87 : vector<8x128xf32>
    %96 = arith.addf %94, %95 : vector<8x128xf32>
    %97 = math.tanh %96 : vector<8x128xf32>
    %98 = arith.mulf %93, %97 : vector<8x128xf32>
    %c16_34 = arith.constant 16 : index
    %c0_35 = arith.constant 0 : index
    %99 = vector.load %arg11[%c16_34, %c0_35] : memref<64x128xf32, #tpu.memory_space<vmem>>, vector<8x128xf32>
    tpu.vector_store %arg11[%c16_34, %c0_35], %98 {strides = array<i32>} : memref<64x128xf32, #tpu.memory_space<vmem>>, vector<8x128xf32>,
    %c24 = arith.constant 24 : index
    %c0_36 = arith.constant 0 : index
    %100 = vector.load %arg10[%c24, %c0_36] : memref<64x512xf32, #tpu.memory_space<vmem>>, vector<8x512xf32>
    %cst_37 = arith.constant dense<0.000000e+00> : vector<8x512xf32>
    %101 = tpu.matmul %98, %1, %cst_37 {dimension_numbers = #tpu.dot_dimension_numbers<[1], [0], [0], [1], [0, 0, 1, 1], [], []>} : vector<8x128xf32>, vector<128x512xf32>, vector<8x512xf32> -> vector<8x512xf32>
    %102 = arith.addf %100, %101 : vector<8x512xf32>
    %103 = vector.extract_strided_slice %102 {offsets = [0, 0], sizes = [8, 128], strides = [1, 1]} : vector<8x512xf32> to vector<8x128xf32>
    %104 = arith.negf %103 : vector<8x128xf32>
    %105 = math.exp %104 : vector<8x128xf32>
    %cst_38 = arith.constant 1.000000e+00 : f32
    %106 = vector.broadcast %cst_38 : f32 to vector<8x128xf32>
    %107 = arith.addf %106, %105 : vector<8x128xf32>
    %108 = arith.divf %106, %107 : vector<8x128xf32>
    %109 = vector.extract_strided_slice %102 {offsets = [0, 128], sizes = [8, 128], strides = [1, 1]} : vector<8x512xf32> to vector<8x128xf32>
    %110 = arith.negf %109 : vector<8x128xf32>
    %111 = math.exp %110 : vector<8x128xf32>
    %cst_39 = arith.constant 1.000000e+00 : f32
    %112 = vector.broadcast %cst_39 : f32 to vector<8x128xf32>
    %113 = arith.addf %112, %111 : vector<8x128xf32>
    %114 = arith.divf %112, %113 : vector<8x128xf32>
    %115 = vector.extract_strided_slice %102 {offsets = [0, 256], sizes = [8, 128], strides = [1, 1]} : vector<8x512xf32> to vector<8x128xf32>
    %116 = math.tanh %115 : vector<8x128xf32>
    %117 = vector.extract_strided_slice %102 {offsets = [0, 384], sizes = [8, 128], strides = [1, 1]} : vector<8x512xf32> to vector<8x128xf32>
    %118 = arith.negf %117 : vector<8x128xf32>
    %119 = math.exp %118 : vector<8x128xf32>
    %cst_40 = arith.constant 1.000000e+00 : f32
    %120 = vector.broadcast %cst_40 : f32 to vector<8x128xf32>
    %121 = arith.addf %120, %119 : vector<8x128xf32>
    %122 = arith.divf %120, %121 : vector<8x128xf32>
    %123 = arith.mulf %114, %96 : vector<8x128xf32>
    %124 = arith.mulf %108, %116 : vector<8x128xf32>
    %125 = arith.addf %123, %124 : vector<8x128xf32>
    %126 = math.tanh %125 : vector<8x128xf32>
    %127 = arith.mulf %122, %126 : vector<8x128xf32>
    %c24_41 = arith.constant 24 : index
    %c0_42 = arith.constant 0 : index
    %128 = vector.load %arg11[%c24_41, %c0_42] : memref<64x128xf32, #tpu.memory_space<vmem>>, vector<8x128xf32>
    tpu.vector_store %arg11[%c24_41, %c0_42], %127 {strides = array<i32>} : memref<64x128xf32, #tpu.memory_space<vmem>>, vector<8x128xf32>,
    %c32 = arith.constant 32 : index
    %c0_43 = arith.constant 0 : index
    %129 = vector.load %arg10[%c32, %c0_43] : memref<64x512xf32, #tpu.memory_space<vmem>>, vector<8x512xf32>
    %cst_44 = arith.constant dense<0.000000e+00> : vector<8x512xf32>
    %130 = tpu.matmul %127, %1, %cst_44 {dimension_numbers = #tpu.dot_dimension_numbers<[1], [0], [0], [1], [0, 0, 1, 1], [], []>} : vector<8x128xf32>, vector<128x512xf32>, vector<8x512xf32> -> vector<8x512xf32>
    %131 = arith.addf %129, %130 : vector<8x512xf32>
    %132 = vector.extract_strided_slice %131 {offsets = [0, 0], sizes = [8, 128], strides = [1, 1]} : vector<8x512xf32> to vector<8x128xf32>
    %133 = arith.negf %132 : vector<8x128xf32>
    %134 = math.exp %133 : vector<8x128xf32>
    %cst_45 = arith.constant 1.000000e+00 : f32
    %135 = vector.broadcast %cst_45 : f32 to vector<8x128xf32>
    %136 = arith.addf %135, %134 : vector<8x128xf32>
    %137 = arith.divf %135, %136 : vector<8x128xf32>
    %138 = vector.extract_strided_slice %131 {offsets = [0, 128], sizes = [8, 128], strides = [1, 1]} : vector<8x512xf32> to vector<8x128xf32>
    %139 = arith.negf %138 : vector<8x128xf32>
    %140 = math.exp %139 : vector<8x128xf32>
    %cst_46 = arith.constant 1.000000e+00 : f32
    %141 = vector.broadcast %cst_46 : f32 to vector<8x128xf32>
    %142 = arith.addf %141, %140 : vector<8x128xf32>
    %143 = arith.divf %141, %142 : vector<8x128xf32>
    %144 = vector.extract_strided_slice %131 {offsets = [0, 256], sizes = [8, 128], strides = [1, 1]} : vector<8x512xf32> to vector<8x128xf32>
    %145 = math.tanh %144 : vector<8x128xf32>
    %146 = vector.extract_strided_slice %131 {offsets = [0, 384], sizes = [8, 128], strides = [1, 1]} : vector<8x512xf32> to vector<8x128xf32>
    %147 = arith.negf %146 : vector<8x128xf32>
    %148 = math.exp %147 : vector<8x128xf32>
    %cst_47 = arith.constant 1.000000e+00 : f32
    %149 = vector.broadcast %cst_47 : f32 to vector<8x128xf32>
    %150 = arith.addf %149, %148 : vector<8x128xf32>
    %151 = arith.divf %149, %150 : vector<8x128xf32>
    %152 = arith.mulf %143, %125 : vector<8x128xf32>
    %153 = arith.mulf %137, %145 : vector<8x128xf32>
    %154 = arith.addf %152, %153 : vector<8x128xf32>
    %155 = math.tanh %154 : vector<8x128xf32>
    %156 = arith.mulf %151, %155 : vector<8x128xf32>
    %c32_48 = arith.constant 32 : index
    %c0_49 = arith.constant 0 : index
    %157 = vector.load %arg11[%c32_48, %c0_49] : memref<64x128xf32, #tpu.memory_space<vmem>>, vector<8x128xf32>
    tpu.vector_store %arg11[%c32_48, %c0_49], %156 {strides = array<i32>} : memref<64x128xf32, #tpu.memory_space<vmem>>, vector<8x128xf32>,
    %c40 = arith.constant 40 : index
    %c0_50 = arith.constant 0 : index
    %158 = vector.load %arg10[%c40, %c0_50] : memref<64x512xf32, #tpu.memory_space<vmem>>, vector<8x512xf32>
    %cst_51 = arith.constant dense<0.000000e+00> : vector<8x512xf32>
    %159 = tpu.matmul %156, %1, %cst_51 {dimension_numbers = #tpu.dot_dimension_numbers<[1], [0], [0], [1], [0, 0, 1, 1], [], []>} : vector<8x128xf32>, vector<128x512xf32>, vector<8x512xf32> -> vector<8x512xf32>
    %160 = arith.addf %158, %159 : vector<8x512xf32>
    %161 = vector.extract_strided_slice %160 {offsets = [0, 0], sizes = [8, 128], strides = [1, 1]} : vector<8x512xf32> to vector<8x128xf32>
    %162 = arith.negf %161 : vector<8x128xf32>
    %163 = math.exp %162 : vector<8x128xf32>
    %cst_52 = arith.constant 1.000000e+00 : f32
    %164 = vector.broadcast %cst_52 : f32 to vector<8x128xf32>
    %165 = arith.addf %164, %163 : vector<8x128xf32>
    %166 = arith.divf %164, %165 : vector<8x128xf32>
    %167 = vector.extract_strided_slice %160 {offsets = [0, 128], sizes = [8, 128], strides = [1, 1]} : vector<8x512xf32> to vector<8x128xf32>
    %168 = arith.negf %167 : vector<8x128xf32>
    %169 = math.exp %168 : vector<8x128xf32>
    %cst_53 = arith.constant 1.000000e+00 : f32
    %170 = vector.broadcast %cst_53 : f32 to vector<8x128xf32>
    %171 = arith.addf %170, %169 : vector<8x128xf32>
    %172 = arith.divf %170, %171 : vector<8x128xf32>
    %173 = vector.extract_strided_slice %160 {offsets = [0, 256], sizes = [8, 128], strides = [1, 1]} : vector<8x512xf32> to vector<8x128xf32>
    %174 = math.tanh %173 : vector<8x128xf32>
    %175 = vector.extract_strided_slice %160 {offsets = [0, 384], sizes = [8, 128], strides = [1, 1]} : vector<8x512xf32> to vector<8x128xf32>
    %176 = arith.negf %175 : vector<8x128xf32>
    %177 = math.exp %176 : vector<8x128xf32>
    %cst_54 = arith.constant 1.000000e+00 : f32
    %178 = vector.broadcast %cst_54 : f32 to vector<8x128xf32>
    %179 = arith.addf %178, %177 : vector<8x128xf32>
    %180 = arith.divf %178, %179 : vector<8x128xf32>
    %181 = arith.mulf %172, %154 : vector<8x128xf32>
    %182 = arith.mulf %166, %174 : vector<8x128xf32>
    %183 = arith.addf %181, %182 : vector<8x128xf32>
    %184 = math.tanh %183 : vector<8x128xf32>
    %185 = arith.mulf %180, %184 : vector<8x128xf32>
    %c40_55 = arith.constant 40 : index
    %c0_56 = arith.constant 0 : index
    %186 = vector.load %arg11[%c40_55, %c0_56] : memref<64x128xf32, #tpu.memory_space<vmem>>, vector<8x128xf32>
    tpu.vector_store %arg11[%c40_55, %c0_56], %185 {strides = array<i32>} : memref<64x128xf32, #tpu.memory_space<vmem>>, vector<8x128xf32>,
    %c48 = arith.constant 48 : index
    %c0_57 = arith.constant 0 : index
    %187 = vector.load %arg10[%c48, %c0_57] : memref<64x512xf32, #tpu.memory_space<vmem>>, vector<8x512xf32>
    %cst_58 = arith.constant dense<0.000000e+00> : vector<8x512xf32>
    %188 = tpu.matmul %185, %1, %cst_58 {dimension_numbers = #tpu.dot_dimension_numbers<[1], [0], [0], [1], [0, 0, 1, 1], [], []>} : vector<8x128xf32>, vector<128x512xf32>, vector<8x512xf32> -> vector<8x512xf32>
    %189 = arith.addf %187, %188 : vector<8x512xf32>
    %190 = vector.extract_strided_slice %189 {offsets = [0, 0], sizes = [8, 128], strides = [1, 1]} : vector<8x512xf32> to vector<8x128xf32>
    %191 = arith.negf %190 : vector<8x128xf32>
    %192 = math.exp %191 : vector<8x128xf32>
    %cst_59 = arith.constant 1.000000e+00 : f32
    %193 = vector.broadcast %cst_59 : f32 to vector<8x128xf32>
    %194 = arith.addf %193, %192 : vector<8x128xf32>
    %195 = arith.divf %193, %194 : vector<8x128xf32>
    %196 = vector.extract_strided_slice %189 {offsets = [0, 128], sizes = [8, 128], strides = [1, 1]} : vector<8x512xf32> to vector<8x128xf32>
    %197 = arith.negf %196 : vector<8x128xf32>
    %198 = math.exp %197 : vector<8x128xf32>
    %cst_60 = arith.constant 1.000000e+00 : f32
    %199 = vector.broadcast %cst_60 : f32 to vector<8x128xf32>
    %200 = arith.addf %199, %198 : vector<8x128xf32>
    %201 = arith.divf %199, %200 : vector<8x128xf32>
    %202 = vector.extract_strided_slice %189 {offsets = [0, 256], sizes = [8, 128], strides = [1, 1]} : vector<8x512xf32> to vector<8x128xf32>
    %203 = math.tanh %202 : vector<8x128xf32>
    %204 = vector.extract_strided_slice %189 {offsets = [0, 384], sizes = [8, 128], strides = [1, 1]} : vector<8x512xf32> to vector<8x128xf32>
    %205 = arith.negf %204 : vector<8x128xf32>
    %206 = math.exp %205 : vector<8x128xf32>
    %cst_61 = arith.constant 1.000000e+00 : f32
    %207 = vector.broadcast %cst_61 : f32 to vector<8x128xf32>
    %208 = arith.addf %207, %206 : vector<8x128xf32>
    %209 = arith.divf %207, %208 : vector<8x128xf32>
    %210 = arith.mulf %201, %183 : vector<8x128xf32>
    %211 = arith.mulf %195, %203 : vector<8x128xf32>
    %212 = arith.addf %210, %211 : vector<8x128xf32>
    %213 = math.tanh %212 : vector<8x128xf32>
    %214 = arith.mulf %209, %213 : vector<8x128xf32>
    %c48_62 = arith.constant 48 : index
    %c0_63 = arith.constant 0 : index
    %215 = vector.load %arg11[%c48_62, %c0_63] : memref<64x128xf32, #tpu.memory_space<vmem>>, vector<8x128xf32>
    tpu.vector_store %arg11[%c48_62, %c0_63], %214 {strides = array<i32>} : memref<64x128xf32, #tpu.memory_space<vmem>>, vector<8x128xf32>,
    %c56 = arith.constant 56 : index
    %c0_64 = arith.constant 0 : index
    %216 = vector.load %arg10[%c56, %c0_64] : memref<64x512xf32, #tpu.memory_space<vmem>>, vector<8x512xf32>
    %cst_65 = arith.constant dense<0.000000e+00> : vector<8x512xf32>
    %217 = tpu.matmul %214, %1, %cst_65 {dimension_numbers = #tpu.dot_dimension_numbers<[1], [0], [0], [1], [0, 0, 1, 1], [], []>} : vector<8x128xf32>, vector<128x512xf32>, vector<8x512xf32> -> vector<8x512xf32>
    %218 = arith.addf %216, %217 : vector<8x512xf32>
    %219 = vector.extract_strided_slice %218 {offsets = [0, 0], sizes = [8, 128], strides = [1, 1]} : vector<8x512xf32> to vector<8x128xf32>
    %220 = arith.negf %219 : vector<8x128xf32>
    %221 = math.exp %220 : vector<8x128xf32>
    %cst_66 = arith.constant 1.000000e+00 : f32
    %222 = vector.broadcast %cst_66 : f32 to vector<8x128xf32>
    %223 = arith.addf %222, %221 : vector<8x128xf32>
    %224 = arith.divf %222, %223 : vector<8x128xf32>
    %225 = vector.extract_strided_slice %218 {offsets = [0, 128], sizes = [8, 128], strides = [1, 1]} : vector<8x512xf32> to vector<8x128xf32>
    %226 = arith.negf %225 : vector<8x128xf32>
    %227 = math.exp %226 : vector<8x128xf32>
    %cst_67 = arith.constant 1.000000e+00 : f32
    %228 = vector.broadcast %cst_67 : f32 to vector<8x128xf32>
    %229 = arith.addf %228, %227 : vector<8x128xf32>
    %230 = arith.divf %228, %229 : vector<8x128xf32>
    %231 = vector.extract_strided_slice %218 {offsets = [0, 256], sizes = [8, 128], strides = [1, 1]} : vector<8x512xf32> to vector<8x128xf32>
    %232 = math.tanh %231 : vector<8x128xf32>
    %233 = vector.extract_strided_slice %218 {offsets = [0, 384], sizes = [8, 128], strides = [1, 1]} : vector<8x512xf32> to vector<8x128xf32>
    %234 = arith.negf %233 : vector<8x128xf32>
    %235 = math.exp %234 : vector<8x128xf32>
    %cst_68 = arith.constant 1.000000e+00 : f32
    %236 = vector.broadcast %cst_68 : f32 to vector<8x128xf32>
    %237 = arith.addf %236, %235 : vector<8x128xf32>
    %238 = arith.divf %236, %237 : vector<8x128xf32>
    %239 = arith.mulf %230, %212 : vector<8x128xf32>
    %240 = arith.mulf %224, %232 : vector<8x128xf32>
    %241 = arith.addf %239, %240 : vector<8x128xf32>
    %242 = math.tanh %241 : vector<8x128xf32>
    %243 = arith.mulf %238, %242 : vector<8x128xf32>
    %c56_69 = arith.constant 56 : index
    %c0_70 = arith.constant 0 : index
    %244 = vector.load %arg11[%c56_69, %c0_70] : memref<64x128xf32, #tpu.memory_space<vmem>>, vector<8x128xf32>
    tpu.vector_store %arg11[%c56_69, %c0_70], %243 {strides = array<i32>} : memref<64x128xf32, #tpu.memory_space<vmem>>, vector<8x128xf32>,
    %c0_71 = arith.constant 0 : index
    %c0_72 = arith.constant 0 : index
    %245 = vector.load %arg11[%c0_71, %c0_72] : memref<64x128xf32, #tpu.memory_space<vmem>>, vector<64x128xf32>
    %c0_73 = arith.constant 0 : index
    %c0_74 = arith.constant 0 : index
    %c0_75 = arith.constant 0 : index
    %246 = vector.load %arg5[%c0_73, %c0_74, %c0_75] : memref<1x128x4xf32, #tpu.memory_space<vmem>>, vector<1x128x4xf32>
    %247 = vector.shape_cast %246 : vector<1x128x4xf32> to vector<128x4xf32>
    %cst_76 = arith.constant dense<0.000000e+00> : vector<64x4xf32>
    %248 = tpu.matmul %245, %247, %cst_76 {dimension_numbers = #tpu.dot_dimension_numbers<[1], [0], [0], [1], [0, 0, 1, 1], [], []>} : vector<64x128xf32>, vector<128x4xf32>, vector<64x4xf32> -> vector<64x4xf32>
    %c0_77 = arith.constant 0 : index
    %c0_78 = arith.constant 0 : index
    %c0_79 = arith.constant 0 : index
    %249 = vector.load %arg6[%c0_77, %c0_78, %c0_79] : memref<1x1x4xf32, #tpu.memory_space<vmem>>, vector<1x1x4xf32>
    %250 = vector.shape_cast %249 : vector<1x1x4xf32> to vector<1x4xf32>
    %251 = vector.broadcast %250 : vector<1x4xf32> to vector<64x4xf32>
    %252 = arith.addf %248, %251 : vector<64x4xf32>
    %c0_80 = arith.constant 0 : index
    %c0_81 = arith.constant 0 : index
    %c0_82 = arith.constant 0 : index
    %253 = vector.load %arg7[%c0_80, %c0_81, %c0_82] : memref<1x64x4xf32, #tpu.memory_space<vmem>>, vector<1x64x4xf32>
    %254 = vector.shape_cast %253 : vector<1x64x4xf32> to vector<64x4xf32>
    %255 = vector.shape_cast %252 : vector<64x4xf32> to vector<1x64x4xf32>
    tpu.vector_store %arg7[%c0_80, %c0_81, %c0_82], %255 {strides = array<i32>} : memref<1x64x4xf32, #tpu.memory_space<vmem>>, vector<1x64x4xf32>,
    %c0_83 = arith.constant 0 : index
    %c0_84 = arith.constant 0 : index
    %c0_85 = arith.constant 0 : index
    %256 = vector.load %arg8[%c0_83, %c0_84, %c0_85] : memref<1x8x128xf32, #tpu.memory_space<vmem>>, vector<1x8x128xf32>
    %257 = vector.shape_cast %256 : vector<1x8x128xf32> to vector<8x128xf32>
    %258 = vector.shape_cast %243 : vector<8x128xf32> to vector<1x8x128xf32>
    tpu.vector_store %arg8[%c0_83, %c0_84, %c0_85], %258 {strides = array<i32>} : memref<1x8x128xf32, #tpu.memory_space<vmem>>, vector<1x8x128xf32>,
    %c0_86 = arith.constant 0 : index
    %c0_87 = arith.constant 0 : index
    %c0_88 = arith.constant 0 : index
    %259 = vector.load %arg9[%c0_86, %c0_87, %c0_88] : memref<1x8x128xf32, #tpu.memory_space<vmem>>, vector<1x8x128xf32>
    %260 = vector.shape_cast %259 : vector<1x8x128xf32> to vector<8x128xf32>
    %261 = vector.shape_cast %241 : vector<8x128xf32> to vector<1x8x128xf32>
    tpu.vector_store %arg9[%c0_86, %c0_87, %c0_88], %261 {strides = array<i32>} : memref<1x8x128xf32, #tpu.memory_space<vmem>>, vector<1x8x128xf32>,
    return
  }
  func.func @transform_0(%arg0: i32) -> (i32, i32) {
    %c0_i32 = arith.constant 0 : i32
    %c0_i32_0 = arith.constant 0 : i32
    %c0_i32_1 = arith.constant 0 : i32
    return %c0_i32, %c0_i32_0 : i32, i32
  }
  func.func @transform_1(%arg0: i32) -> (i32, i32, i32) {
    %c0_i32 = arith.constant 0 : i32
    %c0_i32_0 = arith.constant 0 : i32
    %c0_i32_1 = arith.constant 0 : i32
    return %arg0, %c0_i32, %c0_i32_0 : i32, i32, i32
  }
  func.func @transform_2(%arg0: i32) -> (i32, i32, i32) {
    %c0_i32 = arith.constant 0 : i32
    %c0_i32_0 = arith.constant 0 : i32
    %c0_i32_1 = arith.constant 0 : i32
    return %arg0, %c0_i32, %c0_i32_0 : i32, i32, i32
  }
  func.func @transform_3(%arg0: i32) -> (i32, i32, i32) {
    %c0_i32 = arith.constant 0 : i32
    %c0_i32_0 = arith.constant 0 : i32
    %c0_i32_1 = arith.constant 0 : i32
    return %arg0, %c0_i32, %c0_i32_0 : i32, i32, i32
  }
  func.func @transform_4(%arg0: i32) -> (i32, i32, i32) {
    %c0_i32 = arith.constant 0 : i32
    %c0_i32_0 = arith.constant 0 : i32
    %c0_i32_1 = arith.constant 0 : i32
    return %arg0, %c0_i32, %c0_i32_0 : i32, i32, i32
  }
  func.func @transform_5(%arg0: i32) -> (i32, i32, i32) {
    %c0_i32 = arith.constant 0 : i32
    %c0_i32_0 = arith.constant 0 : i32
    %c0_i32_1 = arith.constant 0 : i32
    return %arg0, %c0_i32, %c0_i32_0 : i32, i32, i32
  }
  func.func @transform_6(%arg0: i32) -> (i32, i32, i32) {
    %c0_i32 = arith.constant 0 : i32
    %c0_i32_0 = arith.constant 0 : i32
    %c0_i32_1 = arith.constant 0 : i32
    return %arg0, %c0_i32, %c0_i32_0 : i32, i32, i32
  }
  func.func @transform_7(%arg0: i32) -> (i32, i32, i32) {
    %c0_i32 = arith.constant 0 : i32
    %c0_i32_0 = arith.constant 0 : i32
    %c0_i32_1 = arith.constant 0 : i32
    return %arg0, %c0_i32, %c0_i32_0 : i32, i32, i32
  }
  func.func @transform_8(%arg0: i32) -> (i32, i32, i32) {
    %c0_i32 = arith.constant 0 : i32
    %c0_i32_0 = arith.constant 0 : i32
    %c0_i32_1 = arith.constant 0 : i32
    return %arg0, %c0_i32, %c0_i32_0 : i32, i32, i32
  }
}

</mosaic_0001>

<bundles_post_ra>
// kernel: clstm_forward.1
= control target key start
LH: loop header
LB: loop body
LE: loop exit
PB: predicated region body
PF: predicated region fallthrough
CT: control target
= control target key end

     0   :  { %vm151_vm0 = vcmask 1043456   ;;  %v2828_v1 = vmov 0.0   ;;  %vm126_vm1 = vcmask 31744   ;;  %s3676_s1 = inlined_call_operand.vmem [shape: f32[1,4,512], index: 1, kind: input, shape index: {}]   ;;  %s3677_s0 = inlined_call_operand.vmem [shape: f32[64,4], index: 0, kind: input, shape index: {}]   ;;  %s3678_s2 = inlined_call_operand.vmem [shape: f32[1,128,512], index: 2, kind: input, shape index: {}]   ;;  %s3679_s3 = inlined_call_operand.vmem [shape: f32[1,1,512], index: 3, kind: input, shape index: {}]   ;;  %s3680_s4 = inlined_call_operand.vmem [shape: f32[1,128,4], index: 4, kind: input, shape index: {}]   ;;  %s3681_s5 = inlined_call_operand.vmem [shape: f32[1,1,4], index: 5, kind: input, shape index: {}]   ;;  %s3682_s8 = inlined_call_operand.vmem [shape: f32[1,8,128], index: 8, kind: output, shape index: {2}]   ;;  %s3683_s6 = inlined_call_operand.vmem [shape: f32[1,64,4], index: 6, kind: output, shape index: {0}]   ;;  %s3684_s7 = inlined_call_operand.vmem [shape: f32[1,8,128], index: 7, kind: output, shape index: {1}]  }
   0x1   :  { %v99_v0 = vld [vmem:[%s3676_s1 + $0x8] sm:$0xff]  ;;  %337 = vmatprep.mubr.f32.mxu1 %v2828_v1  ;;  %224 = vmatprep.mubr.f32.mxu0 %v2828_v1  ;;  %v26_v5 = vld [vmem:[%s3678_s2] sm:$0xff]  ;;  %v2950_v24 = vld [vmem:[%s3677_s0 + $0x10] sm:$0xff] }
   0x2   :  { %v27_v2 = vld [vmem:[%s3678_s2 + $0x8] sm:$0xff]  ;;  %v125_v3 = vcombine.high %v99_v0, %v99_v0  ;;  %v30_v6 = vld [vmem:[%s3678_s2 + $0x20] sm:$0xff]  ;;  %v2979_v33 = vld [vmem:[%s3677_s0 + $0x18] sm:$0xff] }
   0x3   :  { %v31_v4 = vld [vmem:[%s3678_s2 + $0x28] sm:$0xff]  ;;  %v90_v7 = vld [vmem:[%s3677_s0] sm:$0xff]  ;;  %v2896_v9 = vpack.c.bf16 %v30_v6, %v26_v5  ;;  %v96_v54 = vld [vmem:[%s3677_s0 + $0x30] sm:$0xff] }
   0x4   :  { %v2894_v8 = vpack.c.bf16 %v31_v4, %v27_v2  ;;  %v35_v10 = vld [vmem:[%s3678_s2 + $0x48] sm:$0xff]  ;;  %1986 = vmatprep.subr.msk.mxu1 %vm151_vm0, %v125_v3  ;;  %v34_v13 = vld [vmem:[%s3678_s2 + $0x40] sm:$0xff]  ;;  %v29_v59 = vld [vmem:[%s3678_s2 + $0x18] sm:$0xff] }
   0x5   :  { %v39_v11 = vld [vmem:[%s3678_s2 + $0x68] sm:$0xff]  ;;  %v38_v14 = vld [vmem:[%s3678_s2 + $0x60] sm:$0xff]  ;;  %1987 = vmatpush1.msk.msra.mxu1 %vm151_vm0, %v99_v0  ;;  %v33_v60 = vld [vmem:[%s3678_s2 + $0x38] sm:$0xff] }
   0x6   :  { %v2905_v12 = vpack.c.bf16 %v39_v11, %v35_v10  ;;  %v43_v15 = vld [vmem:[%s3678_s2 + $0x88] sm:$0xff]  ;;  %1988 = vmatmul.mubr.msk.f32.vlgmr.msra.gmra.mrb[0].mxu1 %vm126_vm1, %v90_v7  ;;  %2090 = vmatprep.subr.bf16.mxu1 %v2894_v8  ;;  %v2927_v18 = vpack.c.bf16 %v38_v14, %v34_v13  ;;  %v42_v20 = vld [vmem:[%s3678_s2 + $0x80] sm:$0xff]  ;;  %v97_v61 = vld [vmem:[%s3677_s0 + $0x38] sm:$0xff]  ;;  %v3099_v63 = vpack.c.bf16 %v33_v60, %v29_v59 }
   0x7   :  { %v47_v16 = vld [vmem:[%s3678_s2 + $0xa8] sm:$0xff]  ;;  %2092 = vmatpush1.bf16.msra.mxu1 %v2896_v9  ;;  %343 = vmatprep.mubr.f32.mxu1 %v2828_v1  ;;  %v46_v21 = vld [vmem:[%s3678_s2 + $0xa0] sm:$0xff]  ;;  %v28_v0 = vld [vmem:[%s3678_s2 + $0x10] sm:$0xff] }
   0x8   :  { %v91_v17 = vld [vmem:[%s3677_s0 + $0x8] sm:$0xff]  ;;  %2094 = vmatprep.subr.bf16.mxu1 %v2905_v12  ;;  %v2930_v19 = vpack.c.bf16 %v47_v16, %v43_v15  ;;  %v2952_v25 = vpack.c.bf16 %v46_v21, %v42_v20  ;;  %v50_v27 = vld [vmem:[%s3678_s2 + $0xc0] sm:$0xff]  ;;  %v32_v2 = vld [vmem:[%s3678_s2 + $0x30] sm:$0xff] }
   0x9   :  { %v51_v22 = vld [vmem:[%s3678_s2 + $0xc8] sm:$0xff]  ;;  %v54_v28 = vld [vmem:[%s3678_s2 + $0xe0] sm:$0xff]  ;;  %v37_v3 = vld [vmem:[%s3678_s2 + $0x58] sm:$0xff]  ;;  %v3121_v5 = vpack.c.bf16 %v32_v2, %v28_v0  ;;  %v102_v0 = vlaneseq }
   0xa   :  { %v55_v23 = vld [vmem:[%s3678_s2 + $0xe8] sm:$0xff]  ;;  %1989 = vmatmul.mubr.msk.f32.gmra.mrb[2].mxu1 %vm126_vm1, %v91_v17  ;;  %v98_v31 = vld [vmem:[%s3676_s1] sm:$0xff]  ;;  %v2981_v34 = vpack.c.bf16 %v54_v28, %v50_v27  ;;  %v41_v4 = vld [vmem:[%s3678_s2 + $0x78] sm:$0xff] }
   0xb   :  { %2096 = vmatpush1.bf16.msra.mxu1 %v2927_v18  ;;  %349 = vmatprep.mubr.f32.mxu1 %v2828_v1  ;;  %v2955_v26 = vpack.c.bf16 %v55_v23, %v51_v22  ;;  %v59_v29 = vld [vmem:[%s3678_s2 + $0x108] sm:$0xff]  ;;  %v124_v32 = vcombine.high %v98_v31, %v98_v31  ;;  %v58_v36 = vld [vmem:[%s3678_s2 + $0x100] sm:$0xff]  ;;  %v3124_v6 = vpack.c.bf16 %v41_v4, %v37_v3  ;;  %v40_v10 = vld [vmem:[%s3678_s2 + $0x70] sm:$0xff]  ;;  %v103_v3 = vshrl.u32 %v102_v0, 7 }
   0xc   :  { %2098 = vmatprep.subr.bf16.mxu1 %v2930_v19  ;;  %v63_v30 = vld [vmem:[%s3678_s2 + $0x128] sm:$0xff]  ;;  %v62_v37 = vld [vmem:[%s3678_s2 + $0x120] sm:$0xff]  ;;  %v45_v11 = vld [vmem:[%s3678_s2 + $0x98] sm:$0xff] }
   0xd   :  { %v2984_v35 = vpack.c.bf16 %v63_v30, %v59_v29  ;;  %1976 = vmatprep.subr.msk.mxu0 %vm151_vm0, %v124_v32  ;;  %v67_v38 = vld [vmem:[%s3678_s2 + $0x148] sm:$0xff]  ;;  %v3008_v40 = vld [vmem:[%s3677_s0 + $0x20] sm:$0xff]  ;;  %v3010_v41 = vpack.c.bf16 %v62_v37, %v58_v36  ;;  %v49_v13 = vld [vmem:[%s3678_s2 + $0xb8] sm:$0xff]  ;;  %v104_v4 = vsub.s32 0, %v103_v3 }
   0xe   :  { %1990 = vmatmul.mubr.msk.f32.gmra.mrb[4].mxu1 %vm126_vm1, %v2950_v24  ;;  %v71_v39 = vld [vmem:[%s3678_s2 + $0x168] sm:$0xff]  ;;  %1977 = vmatpush1.msk.msra.mxu0 %vm151_vm0, %v98_v31  ;;  %v66_v43 = vld [vmem:[%s3678_s2 + $0x140] sm:$0xff]  ;;  %v3149_v15 = vpack.c.bf16 %v49_v13, %v45_v11  ;;  %v44_v16 = vld [vmem:[%s3678_s2 + $0x90] sm:$0xff] }
   0xf   :  { %2100 = vmatpush1.bf16.msra.mxu1 %v2952_v25  ;;  %355 = vmatprep.mubr.f32.mxu1 %v2828_v1  ;;  %v3013_v42 = vpack.c.bf16 %v71_v39, %v67_v38  ;;  %v70_v44 = vld [vmem:[%s3678_s2 + $0x160] sm:$0xff]  ;;  %v75_v45 = vld [vmem:[%s3678_s2 + $0x188] sm:$0xff]  ;;  %v53_v20 = vld [vmem:[%s3678_s2 + $0xd8] sm:$0xff] }
  0x10   :  { %2102 = vmatprep.subr.bf16.mxu1 %v2955_v26  ;;  %1978 = vmatmul.mubr.msk.f32.vlgmr.msra.gmra.mrb[0].mxu0 %vm126_vm1, %v90_v7  ;;  %v79_v46 = vld [vmem:[%s3678_s2 + $0x1a8] sm:$0xff]  ;;  %v3040_v48 = vpack.c.bf16 %v70_v44, %v66_v43  ;;  %v74_v50 = vld [vmem:[%s3678_s2 + $0x180] sm:$0xff]  ;;  %v36_v7 = vld [vmem:[%s3678_s2 + $0x50] sm:$0xff] }
  0x11   :  { %2154 = vmatprep.subr.bf16.mxu0 %v2894_v8  ;;  %230 = vmatprep.mubr.f32.mxu0 %v2828_v1  ;;  %v3038_v47 = vld [vmem:[%s3677_s0 + $0x28] sm:$0xff]  ;;  %v3043_v49 = vpack.c.bf16 %v79_v46, %v75_v45  ;;  %v78_v51 = vld [vmem:[%s3678_s2 + $0x1a0] sm:$0xff]  ;;  %v3145_v14 = vpack.c.bf16 %v40_v10, %v36_v7  ;;  %v57_v21 = vld [vmem:[%s3678_s2 + $0xf8] sm:$0xff]  ;;  %v108_v10 = vsub.s32 1, %v103_v3 }
  0x12   :  { %1991 = vmatmul.mubr.msk.f32.gmra.mrb[6].mxu1 %vm126_vm1, %v2979_v33  ;;  %2156 = vmatpush1.bf16.msra.mxu0 %v2896_v9  ;;  %v83_v52 = vld [vmem:[%s3678_s2 + $0x1c8] sm:$0xff]  ;;  %v3068_v55 = vpack.c.bf16 %v78_v51, %v74_v50  ;;  %v82_v57 = vld [vmem:[%s3678_s2 + $0x1c0] sm:$0xff]  ;;  %v3172_v23 = vpack.c.bf16 %v57_v21, %v53_v20  ;;  %v56_v27 = vld [vmem:[%s3678_s2 + $0xf0] sm:$0xff] }
  0x13   :  { %2104 = vmatpush1.bf16.msra.mxu1 %v2981_v34  ;;  %361 = vmatprep.mubr.f32.mxu1 %v2828_v1  ;;  %v87_v53 = vld [vmem:[%s3678_s2 + $0x1e8] sm:$0xff]  ;;  %v86_v58 = vld [vmem:[%s3678_s2 + $0x1e0] sm:$0xff]  ;;  %v61_v28 = vld [vmem:[%s3678_s2 + $0x118] sm:$0xff] }
  0x14   :  { %2106 = vmatprep.subr.bf16.mxu1 %v2984_v35  ;;  %2158 = vmatprep.subr.bf16.mxu0 %v2905_v12  ;;  %v3071_v56 = vpack.c.bf16 %v87_v53, %v83_v52  ;;  %v3096_v62 = vpack.c.bf16 %v86_v58, %v82_v57  ;;  %v65_v29 = vld [vmem:[%s3678_s2 + $0x138] sm:$0xff]  ;;  %v60_v32 = vld [vmem:[%s3678_s2 + $0x110] sm:$0xff]  ;;  %v100_v7 = vld [vmem:[%s3679_s3] sm:$0xf] }
  0x15   :  { %1979 = vmatmul.mubr.msk.f32.gmra.mrb[2].mxu0 %vm126_vm1, %v91_v17  ;;  %v48_v17 = vld [vmem:[%s3678_s2 + $0xb0] sm:$0xff]  ;;  %v3194_v31 = vpack.c.bf16 %v65_v29, %v61_v28  ;;  %v69_v36 = vld [vmem:[%s3678_s2 + $0x158] sm:$0xff]  ;;  %v3287_v11 = vrot.slane %v100_v7, %v104_v4  ;;  %v3289_v13 = vrot.slane %v100_v7, %v108_v10 }
  0x16   :  { %1992 = vmatmul.mubr.msk.f32.gmra.mrb[8].mxu1 %vm126_vm1, %v3008_v40  ;;  %2160 = vmatpush1.bf16.msra.mxu0 %v2927_v18  ;;  %v3169_v22 = vpack.c.bf16 %v48_v17, %v44_v16  ;;  %v73_v37 = vld [vmem:[%s3678_s2 + $0x178] sm:$0xff]  ;;  %v72_v43 = vld [vmem:[%s3678_s2 + $0x170] sm:$0xff] }
  0x17   :  { %2108 = vmatpush1.bf16.msra.mxu1 %v3010_v41  ;;  %367 = vmatprep.mubr.f32.mxu1 %v2828_v1  ;;  %v3216_v39 = vpack.c.bf16 %v73_v37, %v69_v36  ;;  %v77_v44 = vld [vmem:[%s3678_s2 + $0x198] sm:$0xff]  ;;  %v76_v50 = vld [vmem:[%s3678_s2 + $0x190] sm:$0xff]  ;;  %v116_v36 = vsub.s32 3, %v103_v3 }
  0x18   :  { %2110 = vmatprep.subr.bf16.mxu1 %v3013_v42  ;;  %236 = vmatprep.mubr.f32.mxu0 %v2828_v1  ;;  %v81_v45 = vld [vmem:[%s3678_s2 + $0x1b8] sm:$0xff]  ;;  %v80_v51 = vld [vmem:[%s3678_s2 + $0x1b0] sm:$0xff] }
  0x19   :  { %2162 = vmatprep.subr.bf16.mxu0 %v2930_v19  ;;  %1980 = vmatmul.mubr.msk.f32.gmra.mrb[4].mxu0 %vm126_vm1, %v2950_v24  ;;  %v52_v24 = vld [vmem:[%s3678_s2 + $0xd0] sm:$0xff]  ;;  %v85_v52 = vld [vmem:[%s3678_s2 + $0x1d8] sm:$0xff] }
  0x1a   :  { %1993 = vmatmul.mubr.msk.f32.gmra.mrb[10].mxu1 %vm126_vm1, %v3038_v47  ;;  %2164 = vmatpush1.bf16.msra.mxu0 %v2952_v25  ;;  %v3191_v30 = vpack.c.bf16 %v56_v27, %v52_v24  ;;  %v89_v53 = vld [vmem:[%s3678_s2 + $0x1f8] sm:$0xff]  ;;  %v84_v58 = vld [vmem:[%s3678_s2 + $0x1d0] sm:$0xff] }
  0x1b   :  { %2112 = vmatpush1.bf16.msra.mxu1 %v3040_v48  ;;  %373 = vmatprep.mubr.f32.mxu1 %v2828_v1  ;;  %v3252_v57 = vpack.c.bf16 %v89_v53, %v85_v52  ;;  %v88_v59 = vld [vmem:[%s3678_s2 + $0x1f0] sm:$0xff] }
  0x1c   :  { %2114 = vmatprep.subr.bf16.mxu1 %v3043_v49  ;;  %242 = vmatprep.mubr.f32.mxu0 %v2828_v1  ;;  %v3261_v60 = vpack.c.bf16 %v88_v59, %v84_v58 }
  0x1d   :  { %2166 = vmatprep.subr.bf16.mxu0 %v2955_v26  ;;  %1981 = vmatmul.mubr.msk.f32.gmra.mrb[6].mxu0 %vm126_vm1, %v2979_v33  ;;  %v64_v33 = vld [vmem:[%s3678_s2 + $0x130] sm:$0xff] }
  0x1e   :  { %1994 = vmatmul.mubr.msk.f32.gmra.mrb[12].mxu1 %vm126_vm1, %v96_v54  ;;  %2168 = vmatpush1.bf16.msra.mxu0 %v2981_v34  ;;  %v3213_v38 = vpack.c.bf16 %v64_v33, %v60_v32  ;;  %v112_v32 = vsub.s32 2, %v103_v3 }
  0x1f   :  { %2116 = vmatpush1.bf16.msra.mxu1 %v3068_v55  ;;  %379 = vmatprep.mubr.f32.mxu1 %v2828_v1 }
  0x20   :  { %2118 = vmatprep.subr.bf16.mxu1 %v3071_v56  ;;  %248 = vmatprep.mubr.f32.mxu0 %v2828_v1 }
  0x21   :  { %2170 = vmatprep.subr.bf16.mxu0 %v2984_v35  ;;  %1982 = vmatmul.mubr.msk.f32.gmra.mrb[8].mxu0 %vm126_vm1, %v3008_v40  ;;  %v68_v40 = vld [vmem:[%s3678_s2 + $0x150] sm:$0xff] }
  0x22   :  { %1995 = vmatmul.mubr.msk.f32.gmra.mrb[14].mxu1 %vm126_vm1, %v97_v61  ;;  %2172 = vmatpush1.bf16.msra.mxu0 %v3010_v41  ;;  %v3231_v46 = vpack.c.bf16 %v72_v43, %v68_v40  ;;  %v3293_v43 = vrot.slane %v100_v7, %v112_v32 }
  0x23   :  { %2120 = vmatpush1.bf16.msra.mxu1 %v3096_v62  ;;  %486 = vmatprep.mubr.f32.mxu1 %v2828_v1 }
  0x24   :  { %2122 = vmatprep.subr.bf16.mxu1 %v3099_v63  ;;  %254 = vmatprep.mubr.f32.mxu0 %v2828_v1 }
  0x25   :  { %2174 = vmatprep.subr.bf16.mxu0 %v3013_v42  ;;  %1983 = vmatmul.mubr.msk.f32.gmra.mrb[10].mxu0 %vm126_vm1, %v3038_v47  ;;  %v3234_v47 = vpack.c.bf16 %v81_v45, %v77_v44  ;;  %v3295_v45 = vrot.slane %v100_v7, %v116_v36 }
  0x26   :  { %487 = vmatmul.mubr.f32.vlgmr.msra.gmra.mrb[16].mxu1 %v2828_v1  ;;  %2176 = vmatpush1.bf16.msra.mxu0 %v3040_v48 }
  0x27   :  { %2124 = vmatpush1.bf16.msra.mxu1 %v3121_v5  ;;  %557 = vmatprep.mubr.f32.mxu1 %v2828_v1 }
  0x28   :  { %2126 = vmatprep.subr.bf16.mxu1 %v3124_v6  ;;  %260 = vmatprep.mubr.f32.mxu0 %v2828_v1 }
  0x29   :  { %2178 = vmatprep.subr.bf16.mxu0 %v3043_v49  ;;  %1984 = vmatmul.mubr.msk.f32.gmra.mrb[12].mxu0 %vm126_vm1, %v96_v54  ;;  %v3249_v54 = vpack.c.bf16 %v80_v51, %v76_v50 }
  0x2a   :  { %2180 = vmatpush1.bf16.msra.mxu0 %v3068_v55  ;;  %266 = vmatprep.mubr.f32.mxu0 %v2828_v1 }
  0x2b   :  { %2128 = vmatpush1.bf16.msra.mxu1 %v3145_v14  ;;  %2182 = vmatprep.subr.bf16.mxu0 %v3071_v56 }
  0x2c   :  { %2130 = vmatprep.subr.bf16.mxu1 %v3149_v15 }
  0x2d   :  { %1985 = vmatmul.mubr.msk.f32.gmra.mrb[14].mxu0 %vm126_vm1, %v97_v61 }
  0x2e   :  { %2184 = vmatpush1.bf16.msra.mxu0 %v3096_v62  ;;  %661 = vmatprep.mubr.f32.mxu0 %v2828_v1 }
  0x2f   :  { %2132 = vmatpush1.bf16.msra.mxu1 %v3169_v22  ;;  %2218 = vmatprep.subr.bf16.mxu0 %v2894_v8 }
  0x30   :  { %2134 = vmatprep.subr.bf16.mxu1 %v3172_v23 }
  0x33   :  { %2136 = vmatpush1.bf16.msra.mxu1 %v3191_v30 }
  0x34   :  { %2138 = vmatprep.subr.bf16.mxu1 %v3194_v31 }
  0x37   :  { %2140 = vmatpush1.bf16.msra.mxu1 %v3213_v38 }
  0x38   :  { %2142 = vmatprep.subr.bf16.mxu1 %v3216_v39 }
  0x3b   :  { %2144 = vmatpush1.bf16.msra.mxu1 %v3231_v46 }
  0x3c   :  { %2146 = vmatprep.subr.bf16.mxu1 %v3234_v47 }
  0x3f   :  { %2148 = vmatpush1.bf16.msra.mxu1 %v3249_v54 }
  0x40   :  { %2150 = vmatprep.subr.bf16.mxu1 %v3252_v57 }
  0x43   :  { %2152 = vmatpush1.bf16.msra.mxu1 %v3261_v60 }
  0x44   :  { %2186 = vmatprep.subr.bf16.mxu1 %v3099_v63 }
  0x46   :  { %558 = vmatmul.mubr.f32.vlgmr.msra.gmra.mrb[0].mxu1 %v2828_v1 }
  0x47   :  { %2188 = vmatpush1.bf16.msra.mxu1 %v3121_v5  ;;  %732 = vmatprep.mubr.f32.mxu1 %v2828_v1 }
  0x48   :  { %2190 = vmatprep.subr.bf16.mxu1 %v3124_v6 }
  0x4b   :  { %2192 = vmatpush1.bf16.msra.mxu1 %v3145_v14 }
  0x4c   :  { %2194 = vmatprep.subr.bf16.mxu1 %v3149_v15 }
  0x4f   :  { %2196 = vmatpush1.bf16.msra.mxu1 %v3169_v22 }
  0x50   :  { %2198 = vmatprep.subr.bf16.mxu1 %v3172_v23 }
  0x53   :  { %2200 = vmatpush1.bf16.msra.mxu1 %v3191_v30 }
  0x54   :  { %2202 = vmatprep.subr.bf16.mxu1 %v3194_v31 }
  0x57   :  { %2204 = vmatpush1.bf16.msra.mxu1 %v3213_v38 }
  0x58   :  { %2206 = vmatprep.subr.bf16.mxu1 %v3216_v39 }
  0x5b   :  { %2208 = vmatpush1.bf16.msra.mxu1 %v3231_v46 }
  0x5c   :  { %2210 = vmatprep.subr.bf16.mxu1 %v3234_v47 }
  0x5f   :  { %2212 = vmatpush1.bf16.msra.mxu1 %v3249_v54 }
  0x60   :  { %2214 = vmatprep.subr.bf16.mxu1 %v3252_v57 }
  0x63   :  { %2216 = vmatpush1.bf16.msra.mxu1 %v3261_v60 }
  0x64   :  { %2250 = vmatprep.subr.bf16.mxu1 %v3099_v63 }
  0xe3   :  { %v226_v61 = vpop.f32.mrb[0].mxu0 }
  0xe4   :  { %v228_v2 = vpop.f32.mrb[1].mxu0  ;;  %v227_v16 = vadd.f32 %v226_v61, %v3287_v11 }
  0xe5   :  { %v229_v17 = vadd.f32 %v228_v2, %v3289_v13 }
  0xf9   :  { %v488_v20 = vpop.f32.mrb[16].mxu1 }
  0xfa   :  { %v564_v21 = vadd.f32 %v488_v20, %v227_v16  ;;  %v490_v24 = vpop.f32.mrb[17].mxu1 }
  0xfb   :  { %v565_v27 = vadd.f32 %v490_v24, %v229_v17 }
  0xfc   :  { %v1996_v29 = vmul.f32 -1.442695, %v564_v21 }
  0xfd   :  { %v1997_v28 = vmul.f32 -1.442695, %v565_v27 }
  0xff   :  { %2700 = vpow2.f32 %v1997_v28 }
 0x100   :  { %2702 = vpow2.f32 %v1996_v29 }
 0x109   :  { %v2701_v33 = vpop.eup %2700 }
 0x10a   :  { %v2703_v37 = vpop.eup %2702  ;;  %v577_v40 = vadd.f32 1.0, %v2701_v33 }
 0x10b   :  { %v571_v44 = vadd.f32 1.0, %v2703_v37 }
 0x10c   :  { %2704 = vrcp.f32 %v577_v40 }
 0x10d   :  { %2706 = vrcp.f32 %v571_v44 }
 0x116   :  { %v2705_v59 = vpop.eup %2704 }
 0x117   :  { %v2707_v61 = vpop.eup %2706  ;;  %v587_v2 = vmul.f32 0.0, %v2705_v59 }
 0x119   :  { %v559_v50 = vpop.f32.mrb[0].mxu1 }
 0x11a   :  { %v2651_v51 = vadd.f32 %v559_v50, %v3293_v43  ;;  %v561_v52 = vpop.f32.mrb[1].mxu1 }
 0x11b   :  { %v2652_v53 = vadd.f32 %v561_v52, %v3295_v45 }
 0x11c   :  { %2708 = vtanh.f32 %v2651_v51 }
 0x11d   :  { %v1998_v58 = vmul.f32 -1.442695, %v2652_v53 }
 0x11f   :  { %2710 = vpow2.f32 %v1998_v58 }
 0x126   :  { %v2709_v0 = vpop.eup %2708 }
 0x127   :  { %v588_v3 = vmul.f32 %v2709_v0, %v2707_v61 }
 0x129   :  { %v2711_v4 = vpop.eup %2710  ;;  %v3299_v10 = vadd.f32 %v588_v3, %v587_v2 }
 0x12a   :  { %v584_v7 = vadd.f32 1.0, %v2711_v4 }
 0x12b   :  { %2712 = vtanh.f32 %v3299_v10 }
 0x12c   :  { %2714 = vrcp.f32 %v584_v7 }
 0x135   :  { %v2713_v16 = vpop.eup %2712 }
 0x136   :  { %v2715_v17 = vpop.eup %2714 }
 0x137   :  { %v3302_v20 = vmul.f32 %v2715_v17, %v2713_v16 }
 0x139   :  { %662 = vmatmul.mubr.f32.vlgmr.msra.gmra.mrb[2].mxu0 %v3302_v20  ;;  %733 = vmatmul.mubr.f32.vlgmr.msra.gmra.mrb[2].mxu1 %v3302_v20 }
 0x13a   :  { %2220 = vmatpush1.bf16.msra.mxu0 %v2896_v9  ;;  %2252 = vmatpush1.bf16.msra.mxu1 %v3121_v5 }
 0x13b   :  { %2222 = vmatprep.subr.bf16.mxu0 %v2905_v12  ;;  %2254 = vmatprep.subr.bf16.mxu1 %v3124_v6 }
 0x13c   :  { %836 = vmatprep.mubr.f32.mxu0 %v2828_v1  ;;  %907 = vmatprep.mubr.f32.mxu1 %v2828_v1 }
 0x13e   :  { %2224 = vmatpush1.bf16.msra.mxu0 %v2927_v18  ;;  %2256 = vmatpush1.bf16.msra.mxu1 %v3145_v14 }
 0x13f   :  { %2226 = vmatprep.subr.bf16.mxu0 %v2930_v19  ;;  %2258 = vmatprep.subr.bf16.mxu1 %v3149_v15 }
 0x142   :  { %2228 = vmatpush1.bf16.msra.mxu0 %v2952_v25  ;;  %2260 = vmatpush1.bf16.msra.mxu1 %v3169_v22 }
 0x143   :  { %2230 = vmatprep.subr.bf16.mxu0 %v2955_v26  ;;  %2262 = vmatprep.subr.bf16.mxu1 %v3172_v23 }
 0x146   :  { %2232 = vmatpush1.bf16.msra.mxu0 %v2981_v34  ;;  %2264 = vmatpush1.bf16.msra.mxu1 %v3191_v30 }
 0x147   :  { %2234 = vmatprep.subr.bf16.mxu0 %v2984_v35  ;;  %2266 = vmatprep.subr.bf16.mxu1 %v3194_v31 }
 0x14a   :  { %2236 = vmatpush1.bf16.msra.mxu0 %v3010_v41  ;;  %2268 = vmatpush1.bf16.msra.mxu1 %v3213_v38 }
 0x14b   :  { %2238 = vmatprep.subr.bf16.mxu0 %v3013_v42  ;;  %2270 = vmatprep.subr.bf16.mxu1 %v3216_v39 }
 0x14e   :  { %2240 = vmatpush1.bf16.msra.mxu0 %v3040_v48  ;;  %2272 = vmatpush1.bf16.msra.mxu1 %v3231_v46 }
 0x14f   :  { %2242 = vmatprep.subr.bf16.mxu0 %v3043_v49  ;;  %2274 = vmatprep.subr.bf16.mxu1 %v3234_v47 }
 0x152   :  { %2244 = vmatpush1.bf16.msra.mxu0 %v3068_v55  ;;  %2276 = vmatpush1.bf16.msra.mxu1 %v3249_v54 }
 0x153   :  { %2246 = vmatprep.subr.bf16.mxu0 %v3071_v56  ;;  %2278 = vmatprep.subr.bf16.mxu1 %v3252_v57 }
 0x156   :  { %2248 = vmatpush1.bf16.msra.mxu0 %v3096_v62  ;;  %2280 = vmatpush1.bf16.msra.mxu1 %v3261_v60 }
 0x157   :  { %2282 = vmatprep.subr.bf16.mxu0 %v2894_v8  ;;  %2314 = vmatprep.subr.bf16.mxu1 %v3099_v63 }
 0x20c   :  { %v663_v21 = vpop.f32.mrb[2].mxu0  ;;  %v734_v24 = vpop.f32.mrb[2].mxu1 }
 0x20d   :  { %v2637_v27 = vadd.f32 %v663_v21, %v3287_v11  ;;  %v665_v28 = vpop.f32.mrb[3].mxu0  ;;  %v736_v29 = vpop.f32.mrb[3].mxu1  ;;  %v2653_v44 = vadd.f32 %v734_v24, %v3293_v43 }
 0x20e   :  { %v2638_v32 = vadd.f32 %v665_v28, %v3289_v13  ;;  %v2654_v37 = vadd.f32 %v736_v29, %v3295_v45 }
 0x20f   :  { %v1999_v33 = vmul.f32 -1.442695, %v2637_v27 }
 0x210   :  { %v2000_v36 = vmul.f32 -1.442695, %v2638_v32  ;;  %v2001_v40 = vmul.f32 -1.442695, %v2654_v37 }
 0x211   :  { %2716 = vpow2.f32 %v1999_v33 }
 0x212   :  { %2718 = vpow2.f32 %v2000_v36 }
 0x213   :  { %2720 = vpow2.f32 %v2001_v40 }
 0x214   :  { %2722 = vtanh.f32 %v2653_v44 }
 0x21b   :  { %v2717_v50 = vpop.eup %2716 }
 0x21c   :  { %v2719_v51 = vpop.eup %2718  ;;  %v746_v52 = vadd.f32 1.0, %v2717_v50 }
 0x21d   :  { %v752_v53 = vadd.f32 1.0, %v2719_v51  ;;  %v2721_v58 = vpop.eup %2720 }
 0x21e   :  { %2724 = vrcp.f32 %v746_v52  ;;  %v2723_v59 = vpop.eup %2722  ;;  %v759_v3 = vadd.f32 1.0, %v2721_v58 }
 0x21f   :  { %2726 = vrcp.f32 %v752_v53 }
 0x220   :  { %2728 = vrcp.f32 %v759_v3 }
 0x228   :  { %v2725_v61 = vpop.eup %2724 }
 0x229   :  { %v2727_v0 = vpop.eup %2726  ;;  %v763_v2 = vmul.f32 %v2725_v61, %v2723_v59 }
 0x22a   :  { %v762_v4 = vmul.f32 %v2727_v0, %v3299_v10  ;;  %v2729_v16 = vpop.eup %2728 }
 0x22c   :  { %v3345_v7 = vadd.f32 %v763_v2, %v762_v4 }
 0x22e   :  { %2730 = vtanh.f32 %v3345_v7 }
 0x238   :  { %v2731_v17 = vpop.eup %2730 }
 0x239   :  { %v3348_v21 = vmul.f32 %v2731_v17, %v2729_v16 }
 0x23b   :  { %837 = vmatmul.mubr.f32.vlgmr.msra.gmra.mrb[4].mxu0 %v3348_v21  ;;  %908 = vmatmul.mubr.f32.vlgmr.msra.gmra.mrb[4].mxu1 %v3348_v21 }
 0x23c   :  { %2284 = vmatpush1.bf16.msra.mxu0 %v2896_v9  ;;  %2316 = vmatpush1.bf16.msra.mxu1 %v3121_v5 }
 0x23d   :  { %2286 = vmatprep.subr.bf16.mxu0 %v2905_v12  ;;  %2318 = vmatprep.subr.bf16.mxu1 %v3124_v6 }
 0x23e   :  { %1011 = vmatprep.mubr.f32.mxu0 %v2828_v1  ;;  %1082 = vmatprep.mubr.f32.mxu1 %v2828_v1 }
 0x240   :  { %2288 = vmatpush1.bf16.msra.mxu0 %v2927_v18  ;;  %2320 = vmatpush1.bf16.msra.mxu1 %v3145_v14 }
 0x241   :  { %2290 = vmatprep.subr.bf16.mxu0 %v2930_v19  ;;  %2322 = vmatprep.subr.bf16.mxu1 %v3149_v15 }
 0x244   :  { %2292 = vmatpush1.bf16.msra.mxu0 %v2952_v25  ;;  %2324 = vmatpush1.bf16.msra.mxu1 %v3169_v22 }
 0x245   :  { %2294 = vmatprep.subr.bf16.mxu0 %v2955_v26  ;;  %2326 = vmatprep.subr.bf16.mxu1 %v3172_v23 }
 0x248   :  { %2296 = vmatpush1.bf16.msra.mxu0 %v2981_v34  ;;  %2328 = vmatpush1.bf16.msra.mxu1 %v3191_v30 }
 0x249   :  { %2298 = vmatprep.subr.bf16.mxu0 %v2984_v35  ;;  %2330 = vmatprep.subr.bf16.mxu1 %v3194_v31 }
 0x24c   :  { %2300 = vmatpush1.bf16.msra.mxu0 %v3010_v41  ;;  %2332 = vmatpush1.bf16.msra.mxu1 %v3213_v38 }
 0x24d   :  { %2302 = vmatprep.subr.bf16.mxu0 %v3013_v42  ;;  %2334 = vmatprep.subr.bf16.mxu1 %v3216_v39 }
 0x250   :  { %2304 = vmatpush1.bf16.msra.mxu0 %v3040_v48  ;;  %2336 = vmatpush1.bf16.msra.mxu1 %v3231_v46 }
 0x251   :  { %2306 = vmatprep.subr.bf16.mxu0 %v3043_v49  ;;  %2338 = vmatprep.subr.bf16.mxu1 %v3234_v47 }
 0x254   :  { %2308 = vmatpush1.bf16.msra.mxu0 %v3068_v55  ;;  %2340 = vmatpush1.bf16.msra.mxu1 %v3249_v54 }
 0x255   :  { %2310 = vmatprep.subr.bf16.mxu0 %v3071_v56  ;;  %2342 = vmatprep.subr.bf16.mxu1 %v3252_v57 }
 0x258   :  { %2312 = vmatpush1.bf16.msra.mxu0 %v3096_v62  ;;  %2344 = vmatpush1.bf16.msra.mxu1 %v3261_v60 }
 0x259   :  { %2346 = vmatprep.subr.bf16.mxu0 %v2894_v8  ;;  %2378 = vmatprep.subr.bf16.mxu1 %v3099_v63 }
 0x30e   :  { %v838_v10 = vpop.f32.mrb[4].mxu0  ;;  %v909_v24 = vpop.f32.mrb[4].mxu1 }
 0x30f   :  { %v2639_v27 = vadd.f32 %v838_v10, %v3287_v11  ;;  %v840_v28 = vpop.f32.mrb[5].mxu0  ;;  %v911_v29 = vpop.f32.mrb[5].mxu1  ;;  %v2655_v44 = vadd.f32 %v909_v24, %v3293_v43 }
 0x310   :  { %v2640_v32 = vadd.f32 %v840_v28, %v3289_v13  ;;  %v2656_v37 = vadd.f32 %v911_v29, %v3295_v45 }
 0x311   :  { %v2002_v33 = vmul.f32 -1.442695, %v2639_v27 }
 0x312   :  { %v2003_v36 = vmul.f32 -1.442695, %v2640_v32  ;;  %v2004_v40 = vmul.f32 -1.442695, %v2656_v37 }
 0x313   :  { %2732 = vpow2.f32 %v2002_v33 }
 0x314   :  { %2734 = vpow2.f32 %v2003_v36 }
 0x315   :  { %2736 = vpow2.f32 %v2004_v40 }
 0x316   :  { %2738 = vtanh.f32 %v2655_v44 }
 0x31d   :  { %v2733_v50 = vpop.eup %2732 }
 0x31e   :  { %v2735_v51 = vpop.eup %2734  ;;  %v921_v52 = vadd.f32 1.0, %v2733_v50 }
 0x31f   :  { %v927_v53 = vadd.f32 1.0, %v2735_v51  ;;  %v2737_v58 = vpop.eup %2736 }
 0x320   :  { %2740 = vrcp.f32 %v921_v52  ;;  %v2739_v59 = vpop.eup %2738  ;;  %v934_v3 = vadd.f32 1.0, %v2737_v58 }
 0x321   :  { %2742 = vrcp.f32 %v927_v53 }
 0x322   :  { %2744 = vrcp.f32 %v934_v3 }
 0x32a   :  { %v2741_v61 = vpop.eup %2740 }
 0x32b   :  { %v2743_v0 = vpop.eup %2742  ;;  %v938_v2 = vmul.f32 %v2741_v61, %v2739_v59 }
 0x32c   :  { %v937_v4 = vmul.f32 %v2743_v0, %v3345_v7  ;;  %v2745_v17 = vpop.eup %2744 }
 0x32e   :  { %v3391_v16 = vadd.f32 %v938_v2, %v937_v4 }
 0x330   :  { %2746 = vtanh.f32 %v3391_v16 }
 0x33a   :  { %v2747_v10 = vpop.eup %2746 }
 0x33b   :  { %v3394_v24 = vmul.f32 %v2747_v10, %v2745_v17 }
 0x33d   :  { %1012 = vmatmul.mubr.f32.vlgmr.msra.gmra.mrb[6].mxu0 %v3394_v24  ;;  %1083 = vmatmul.mubr.f32.vlgmr.msra.gmra.mrb[6].mxu1 %v3394_v24 }
 0x33e   :  { %2348 = vmatpush1.bf16.msra.mxu0 %v2896_v9  ;;  %2380 = vmatpush1.bf16.msra.mxu1 %v3121_v5 }
 0x33f   :  { %2350 = vmatprep.subr.bf16.mxu0 %v2905_v12  ;;  %2382 = vmatprep.subr.bf16.mxu1 %v3124_v6 }
 0x340   :  { %1186 = vmatprep.mubr.f32.mxu0 %v2828_v1  ;;  %1257 = vmatprep.mubr.f32.mxu1 %v2828_v1 }
 0x342   :  { %2352 = vmatpush1.bf16.msra.mxu0 %v2927_v18  ;;  %2384 = vmatpush1.bf16.msra.mxu1 %v3145_v14 }
 0x343   :  { %2354 = vmatprep.subr.bf16.mxu0 %v2930_v19  ;;  %2386 = vmatprep.subr.bf16.mxu1 %v3149_v15 }
 0x346   :  { %2356 = vmatpush1.bf16.msra.mxu0 %v2952_v25  ;;  %2388 = vmatpush1.bf16.msra.mxu1 %v3169_v22 }
 0x347   :  { %2358 = vmatprep.subr.bf16.mxu0 %v2955_v26  ;;  %2390 = vmatprep.subr.bf16.mxu1 %v3172_v23 }
 0x34a   :  { %2360 = vmatpush1.bf16.msra.mxu0 %v2981_v34  ;;  %2392 = vmatpush1.bf16.msra.mxu1 %v3191_v30 }
 0x34b   :  { %2362 = vmatprep.subr.bf16.mxu0 %v2984_v35  ;;  %2394 = vmatprep.subr.bf16.mxu1 %v3194_v31 }
 0x34e   :  { %2364 = vmatpush1.bf16.msra.mxu0 %v3010_v41  ;;  %2396 = vmatpush1.bf16.msra.mxu1 %v3213_v38 }
 0x34f   :  { %2366 = vmatprep.subr.bf16.mxu0 %v3013_v42  ;;  %2398 = vmatprep.subr.bf16.mxu1 %v3216_v39 }
 0x352   :  { %2368 = vmatpush1.bf16.msra.mxu0 %v3040_v48  ;;  %2400 = vmatpush1.bf16.msra.mxu1 %v3231_v46 }
 0x353   :  { %2370 = vmatprep.subr.bf16.mxu0 %v3043_v49  ;;  %2402 = vmatprep.subr.bf16.mxu1 %v3234_v47 }
 0x356   :  { %2372 = vmatpush1.bf16.msra.mxu0 %v3068_v55  ;;  %2404 = vmatpush1.bf16.msra.mxu1 %v3249_v54 }
 0x357   :  { %2374 = vmatprep.subr.bf16.mxu0 %v3071_v56  ;;  %2406 = vmatprep.subr.bf16.mxu1 %v3252_v57 }
 0x35a   :  { %2376 = vmatpush1.bf16.msra.mxu0 %v3096_v62  ;;  %2408 = vmatpush1.bf16.msra.mxu1 %v3261_v60 }
 0x35b   :  { %2410 = vmatprep.subr.bf16.mxu0 %v2894_v8  ;;  %2442 = vmatprep.subr.bf16.mxu1 %v3099_v63 }
 0x410   :  { %v1013_v7 = vpop.f32.mrb[6].mxu0  ;;  %v1084_v27 = vpop.f32.mrb[6].mxu1 }
 0x411   :  { %v2641_v28 = vadd.f32 %v1013_v7, %v3287_v11  ;;  %v1015_v29 = vpop.f32.mrb[7].mxu0  ;;  %v1086_v32 = vpop.f32.mrb[7].mxu1  ;;  %v2657_v50 = vadd.f32 %v1084_v27, %v3293_v43 }
 0x412   :  { %v2642_v33 = vadd.f32 %v1015_v29, %v3289_v13  ;;  %v2658_v40 = vadd.f32 %v1086_v32, %v3295_v45 }
 0x413   :  { %v2005_v36 = vmul.f32 -1.442695, %v2641_v28 }
 0x414   :  { %v2006_v37 = vmul.f32 -1.442695, %v2642_v33  ;;  %v2007_v44 = vmul.f32 -1.442695, %v2658_v40 }
 0x415   :  { %2748 = vpow2.f32 %v2005_v36 }
 0x416   :  { %2750 = vpow2.f32 %v2006_v37 }
 0x417   :  { %2752 = vpow2.f32 %v2007_v44 }
 0x418   :  { %2754 = vtanh.f32 %v2657_v50 }
 0x41f   :  { %v2749_v51 = vpop.eup %2748 }
 0x420   :  { %v2751_v52 = vpop.eup %2750  ;;  %v1096_v53 = vadd.f32 1.0, %v2749_v51 }
 0x421   :  { %v1102_v58 = vadd.f32 1.0, %v2751_v52  ;;  %v2753_v59 = vpop.eup %2752 }
 0x422   :  { %2756 = vrcp.f32 %v1096_v53  ;;  %v2755_v61 = vpop.eup %2754  ;;  %v1109_v4 = vadd.f32 1.0, %v2753_v59 }
 0x423   :  { %2758 = vrcp.f32 %v1102_v58 }
 0x424   :  { %2760 = vrcp.f32 %v1109_v4 }
 0x42c   :  { %v2757_v0 = vpop.eup %2756 }
 0x42d   :  { %v2759_v2 = vpop.eup %2758  ;;  %v1113_v3 = vmul.f32 %v2757_v0, %v2755_v61 }
 0x42e   :  { %v1112_v17 = vmul.f32 %v2759_v2, %v3391_v16  ;;  %v2761_v7 = vpop.eup %2760 }
 0x430   :  { %v3437_v10 = vadd.f32 %v1113_v3, %v1112_v17 }
 0x432   :  { %2762 = vtanh.f32 %v3437_v10 }
 0x43c   :  { %v2763_v27 = vpop.eup %2762 }
 0x43d   :  { %v3440_v28 = vmul.f32 %v2763_v27, %v2761_v7 }
 0x43f   :  { %1187 = vmatmul.mubr.f32.vlgmr.msra.gmra.mrb[8].mxu0 %v3440_v28  ;;  %1258 = vmatmul.mubr.f32.vlgmr.msra.gmra.mrb[8].mxu1 %v3440_v28 }
 0x440   :  { %2412 = vmatpush1.bf16.msra.mxu0 %v2896_v9  ;;  %2444 = vmatpush1.bf16.msra.mxu1 %v3121_v5 }
 0x441   :  { %2414 = vmatprep.subr.bf16.mxu0 %v2905_v12  ;;  %2446 = vmatprep.subr.bf16.mxu1 %v3124_v6 }
 0x442   :  { %1361 = vmatprep.mubr.f32.mxu0 %v2828_v1  ;;  %1432 = vmatprep.mubr.f32.mxu1 %v2828_v1 }
 0x444   :  { %2416 = vmatpush1.bf16.msra.mxu0 %v2927_v18  ;;  %2448 = vmatpush1.bf16.msra.mxu1 %v3145_v14 }
 0x445   :  { %2418 = vmatprep.subr.bf16.mxu0 %v2930_v19  ;;  %2450 = vmatprep.subr.bf16.mxu1 %v3149_v15 }
 0x448   :  { %2420 = vmatpush1.bf16.msra.mxu0 %v2952_v25  ;;  %2452 = vmatpush1.bf16.msra.mxu1 %v3169_v22 }
 0x449   :  { %2422 = vmatprep.subr.bf16.mxu0 %v2955_v26  ;;  %2454 = vmatprep.subr.bf16.mxu1 %v3172_v23 }
 0x44c   :  { %2424 = vmatpush1.bf16.msra.mxu0 %v2981_v34  ;;  %2456 = vmatpush1.bf16.msra.mxu1 %v3191_v30 }
 0x44d   :  { %2426 = vmatprep.subr.bf16.mxu0 %v2984_v35  ;;  %2458 = vmatprep.subr.bf16.mxu1 %v3194_v31 }
 0x450   :  { %2428 = vmatpush1.bf16.msra.mxu0 %v3010_v41  ;;  %2460 = vmatpush1.bf16.msra.mxu1 %v3213_v38 }
 0x451   :  { %2430 = vmatprep.subr.bf16.mxu0 %v3013_v42  ;;  %2462 = vmatprep.subr.bf16.mxu1 %v3216_v39 }
 0x454   :  { %2432 = vmatpush1.bf16.msra.mxu0 %v3040_v48  ;;  %2464 = vmatpush1.bf16.msra.mxu1 %v3231_v46 }
 0x455   :  { %2434 = vmatprep.subr.bf16.mxu0 %v3043_v49  ;;  %2466 = vmatprep.subr.bf16.mxu1 %v3234_v47 }
 0x458   :  { %2436 = vmatpush1.bf16.msra.mxu0 %v3068_v55  ;;  %2468 = vmatpush1.bf16.msra.mxu1 %v3249_v54 }
 0x459   :  { %2438 = vmatprep.subr.bf16.mxu0 %v3071_v56  ;;  %2470 = vmatprep.subr.bf16.mxu1 %v3252_v57 }
 0x45c   :  { %2440 = vmatpush1.bf16.msra.mxu0 %v3096_v62  ;;  %2472 = vmatpush1.bf16.msra.mxu1 %v3261_v60 }
 0x45d   :  { %2474 = vmatprep.subr.bf16.mxu0 %v2894_v8  ;;  %2506 = vmatprep.subr.bf16.mxu1 %v3099_v63 }
 0x512   :  { %v1188_v16 = vpop.f32.mrb[8].mxu0  ;;  %v1259_v29 = vpop.f32.mrb[8].mxu1 }
 0x513   :  { %v2643_v32 = vadd.f32 %v1188_v16, %v3287_v11  ;;  %v1190_v33 = vpop.f32.mrb[9].mxu0  ;;  %v1261_v36 = vpop.f32.mrb[9].mxu1  ;;  %v2659_v52 = vadd.f32 %v1259_v29, %v3293_v43 }
 0x514   :  { %v2644_v37 = vadd.f32 %v1190_v33, %v3289_v13  ;;  %v2660_v50 = vadd.f32 %v1261_v36, %v3295_v45 }
 0x515   :  { %v2008_v40 = vmul.f32 -1.442695, %v2643_v32 }
 0x516   :  { %v2009_v44 = vmul.f32 -1.442695, %v2644_v37  ;;  %v2010_v51 = vmul.f32 -1.442695, %v2660_v50 }
 0x517   :  { %2764 = vpow2.f32 %v2008_v40 }
 0x518   :  { %2766 = vpow2.f32 %v2009_v44 }
 0x519   :  { %2768 = vpow2.f32 %v2010_v51 }
 0x51a   :  { %2770 = vtanh.f32 %v2659_v52 }
 0x521   :  { %v2765_v53 = vpop.eup %2764 }
 0x522   :  { %v2767_v58 = vpop.eup %2766  ;;  %v1271_v59 = vadd.f32 1.0, %v2765_v53 }
 0x523   :  { %v1277_v61 = vadd.f32 1.0, %v2767_v58  ;;  %v2769_v0 = vpop.eup %2768 }
 0x524   :  { %2772 = vrcp.f32 %v1271_v59  ;;  %v2771_v2 = vpop.eup %2770  ;;  %v1284_v7 = vadd.f32 1.0, %v2769_v0 }
 0x525   :  { %2774 = vrcp.f32 %v1277_v61 }
 0x526   :  { %2776 = vrcp.f32 %v1284_v7 }
 0x52e   :  { %v2773_v3 = vpop.eup %2772 }
 0x52f   :  { %v2775_v4 = vpop.eup %2774  ;;  %v1288_v17 = vmul.f32 %v2773_v3, %v2771_v2 }
 0x530   :  { %v1287_v27 = vmul.f32 %v2775_v4, %v3437_v10  ;;  %v2777_v29 = vpop.eup %2776 }
 0x532   :  { %v3483_v16 = vadd.f32 %v1288_v17, %v1287_v27 }
 0x534   :  { %2778 = vtanh.f32 %v3483_v16 }
 0x53e   :  { %v2779_v32 = vpop.eup %2778 }
 0x53f   :  { %v3486_v33 = vmul.f32 %v2779_v32, %v2777_v29 }
 0x541   :  { %1362 = vmatmul.mubr.f32.vlgmr.msra.gmra.mrb[10].mxu0 %v3486_v33  ;;  %1433 = vmatmul.mubr.f32.vlgmr.msra.gmra.mrb[10].mxu1 %v3486_v33 }
 0x542   :  { %2476 = vmatpush1.bf16.msra.mxu0 %v2896_v9  ;;  %2508 = vmatpush1.bf16.msra.mxu1 %v3121_v5 }
 0x543   :  { %2478 = vmatprep.subr.bf16.mxu0 %v2905_v12  ;;  %2510 = vmatprep.subr.bf16.mxu1 %v3124_v6 }
 0x544   :  { %1536 = vmatprep.mubr.f32.mxu0 %v2828_v1  ;;  %1607 = vmatprep.mubr.f32.mxu1 %v2828_v1 }
 0x546   :  { %2480 = vmatpush1.bf16.msra.mxu0 %v2927_v18  ;;  %2512 = vmatpush1.bf16.msra.mxu1 %v3145_v14 }
 0x547   :  { %2482 = vmatprep.subr.bf16.mxu0 %v2930_v19  ;;  %2514 = vmatprep.subr.bf16.mxu1 %v3149_v15 }
 0x54a   :  { %2484 = vmatpush1.bf16.msra.mxu0 %v2952_v25  ;;  %2516 = vmatpush1.bf16.msra.mxu1 %v3169_v22 }
 0x54b   :  { %2486 = vmatprep.subr.bf16.mxu0 %v2955_v26  ;;  %2518 = vmatprep.subr.bf16.mxu1 %v3172_v23 }
 0x54e   :  { %2488 = vmatpush1.bf16.msra.mxu0 %v2981_v34  ;;  %2520 = vmatpush1.bf16.msra.mxu1 %v3191_v30 }
 0x54f   :  { %2490 = vmatprep.subr.bf16.mxu0 %v2984_v35  ;;  %2522 = vmatprep.subr.bf16.mxu1 %v3194_v31 }
 0x552   :  { %2492 = vmatpush1.bf16.msra.mxu0 %v3010_v41  ;;  %2524 = vmatpush1.bf16.msra.mxu1 %v3213_v38 }
 0x553   :  { %2494 = vmatprep.subr.bf16.mxu0 %v3013_v42  ;;  %2526 = vmatprep.subr.bf16.mxu1 %v3216_v39 }
 0x556   :  { %2496 = vmatpush1.bf16.msra.mxu0 %v3040_v48  ;;  %2528 = vmatpush1.bf16.msra.mxu1 %v3231_v46 }
 0x557   :  { %2498 = vmatprep.subr.bf16.mxu0 %v3043_v49  ;;  %2530 = vmatprep.subr.bf16.mxu1 %v3234_v47 }
 0x55a   :  { %2500 = vmatpush1.bf16.msra.mxu0 %v3068_v55  ;;  %2532 = vmatpush1.bf16.msra.mxu1 %v3249_v54 }
 0x55b   :  { %2502 = vmatprep.subr.bf16.mxu0 %v3071_v56  ;;  %2534 = vmatprep.subr.bf16.mxu1 %v3252_v57 }
 0x55e   :  { %2504 = vmatpush1.bf16.msra.mxu0 %v3096_v62  ;;  %2536 = vmatpush1.bf16.msra.mxu1 %v3261_v60 }
 0x55f   :  { %2538 = vmatprep.subr.bf16.mxu0 %v2894_v8  ;;  %2570 = vmatprep.subr.bf16.mxu1 %v3099_v63 }
 0x614   :  { %v1363_v10 = vpop.f32.mrb[10].mxu0  ;;  %v1434_v36 = vpop.f32.mrb[10].mxu1 }
 0x615   :  { %v2645_v37 = vadd.f32 %v1363_v10, %v3287_v11  ;;  %v1365_v40 = vpop.f32.mrb[11].mxu0  ;;  %v1436_v44 = vpop.f32.mrb[11].mxu1  ;;  %v2661_v59 = vadd.f32 %v1434_v36, %v3293_v43 }
 0x616   :  { %v2646_v50 = vadd.f32 %v1365_v40, %v3289_v13  ;;  %v2662_v53 = vadd.f32 %v1436_v44, %v3295_v45  ;;  %v1830_v40 = vld [vmem:[%s3680_s4 + $0x20] sm:$0xff]  ;;  %v1831_v44 = vld [vmem:[%s3680_s4 + $0x28] sm:$0xff] }
 0x617   :  { %v2011_v51 = vmul.f32 -1.442695, %v2645_v37 }
 0x618   :  { %v2012_v52 = vmul.f32 -1.442695, %v2646_v50  ;;  %v2013_v58 = vmul.f32 -1.442695, %v2662_v53  ;;  %v2609_v50 = vpack.c.bf16 %v1831_v44, %v1830_v40 }
 0x619   :  { %2780 = vpow2.f32 %v2011_v51  ;;  %v1832_v51 = vld [vmem:[%s3680_s4 + $0x30] sm:$0xff] }
 0x61a   :  { %2782 = vpow2.f32 %v2012_v52  ;;  %v1833_v52 = vld [vmem:[%s3680_s4 + $0x38] sm:$0xff] }
 0x61b   :  { %2784 = vpow2.f32 %v2013_v58  ;;  %v2613_v53 = vpack.c.bf16 %v1833_v52, %v1832_v51  ;;  %v1834_v58 = vld [vmem:[%s3680_s4 + $0x40] sm:$0xff] }
 0x61c   :  { %2786 = vtanh.f32 %v2661_v59 }
 0x623   :  { %v2781_v8 = vpop.eup %2780 }
 0x624   :  { %v2783_v61 = vpop.eup %2782  ;;  %v1446_v63 = vadd.f32 1.0, %v2781_v8  ;;  %v1836_v8 = vld [vmem:[%s3680_s4 + $0x50] sm:$0xff] }
 0x625   :  { %v1452_v0 = vadd.f32 1.0, %v2783_v61  ;;  %v2785_v2 = vpop.eup %2784  ;;  %v1837_v61 = vld [vmem:[%s3680_s4 + $0x58] sm:$0xff] }
 0x626   :  { %2788 = vrcp.f32 %v1446_v63  ;;  %v2787_v3 = vpop.eup %2786  ;;  %v1459_v27 = vadd.f32 1.0, %v2785_v2  ;;  %v2621_v63 = vpack.c.bf16 %v1837_v61, %v1836_v8  ;;  %v1839_v2 = vld [vmem:[%s3680_s4 + $0x68] sm:$0xff] }
 0x627   :  { %2790 = vrcp.f32 %v1452_v0  ;;  %v1838_v0 = vld [vmem:[%s3680_s4 + $0x60] sm:$0xff] }
 0x628   :  { %2792 = vrcp.f32 %v1459_v27 }
 0x630   :  { %v2789_v4 = vpop.eup %2788 }
 0x631   :  { %v2791_v17 = vpop.eup %2790  ;;  %v1463_v7 = vmul.f32 %v2789_v4, %v2787_v3  ;;  %v2625_v3 = vpack.c.bf16 %v1839_v2, %v1838_v0  ;;  %v1840_v4 = vld [vmem:[%s3680_s4 + $0x70] sm:$0xff] }
 0x632   :  { %v1462_v29 = vmul.f32 %v2791_v17, %v3483_v16  ;;  %v2793_v10 = vpop.eup %2792  ;;  %v1841_v17 = vld [vmem:[%s3680_s4 + $0x78] sm:$0xff] }
 0x634   :  { %v3529_v32 = vadd.f32 %v1463_v7, %v1462_v29  ;;  %v2629_v7 = vpack.c.bf16 %v1841_v17, %v1840_v4 }
 0x636   :  { %2794 = vtanh.f32 %v3529_v32 }
 0x640   :  { %v2795_v36 = vpop.eup %2794 }
 0x641   :  { %v3532_v37 = vmul.f32 %v2795_v36, %v2793_v10 }
 0x643   :  { %1537 = vmatmul.mubr.f32.vlgmr.msra.gmra.mrb[12].mxu0 %v3532_v37  ;;  %1608 = vmatmul.mubr.f32.vlgmr.msra.gmra.mrb[12].mxu1 %v3532_v37 }
 0x644   :  { %2540 = vmatpush1.bf16.msra.mxu0 %v2896_v9  ;;  %2572 = vmatpush1.bf16.msra.mxu1 %v3121_v5  ;;  %v1827_v9 = vld [vmem:[%s3680_s4 + $0x8] sm:$0xff] }
 0x645   :  { %2542 = vmatprep.subr.bf16.mxu0 %v2905_v12  ;;  %2574 = vmatprep.subr.bf16.mxu1 %v3124_v6 }
 0x646   :  { %1711 = vmatprep.mubr.f32.mxu0 %v2828_v1  ;;  %1782 = vmatprep.mubr.f32.mxu1 %v2828_v1  ;;  %v1826_v1 = vld [vmem:[%s3680_s4] sm:$0xff] }
 0x647   :  { %v2601_v12 = vpack.c.bf16 %v1827_v9, %v1826_v1 }
 0x648   :  { %2544 = vmatpush1.bf16.msra.mxu0 %v2927_v18  ;;  %2576 = vmatpush1.bf16.msra.mxu1 %v3145_v14 }
 0x649   :  { %2546 = vmatprep.subr.bf16.mxu0 %v2930_v19  ;;  %2578 = vmatprep.subr.bf16.mxu1 %v3149_v15 }
 0x64c   :  { %2548 = vmatpush1.bf16.msra.mxu0 %v2952_v25  ;;  %2580 = vmatpush1.bf16.msra.mxu1 %v3169_v22 }
 0x64d   :  { %2550 = vmatprep.subr.bf16.mxu0 %v2955_v26  ;;  %2582 = vmatprep.subr.bf16.mxu1 %v3172_v23 }
 0x650   :  { %2552 = vmatpush1.bf16.msra.mxu0 %v2981_v34  ;;  %2584 = vmatpush1.bf16.msra.mxu1 %v3191_v30 }
 0x651   :  { %2554 = vmatprep.subr.bf16.mxu0 %v2984_v35  ;;  %2586 = vmatprep.subr.bf16.mxu1 %v3194_v31 }
 0x654   :  { %2556 = vmatpush1.bf16.msra.mxu0 %v3010_v41  ;;  %2588 = vmatpush1.bf16.msra.mxu1 %v3213_v38 }
 0x655   :  { %2558 = vmatprep.subr.bf16.mxu0 %v3013_v42  ;;  %2590 = vmatprep.subr.bf16.mxu1 %v3216_v39 }
 0x658   :  { %2560 = vmatpush1.bf16.msra.mxu0 %v3040_v48  ;;  %2592 = vmatpush1.bf16.msra.mxu1 %v3231_v46  ;;  %v1828_v46 = vld [vmem:[%s3680_s4 + $0x10] sm:$0xff] }
 0x659   :  { %2562 = vmatprep.subr.bf16.mxu0 %v3043_v49  ;;  %2594 = vmatprep.subr.bf16.mxu1 %v3234_v47  ;;  %v1829_v47 = vld [vmem:[%s3680_s4 + $0x18] sm:$0xff] }
 0x65a   :  { %v2605_v16 = vpack.c.bf16 %v1829_v47, %v1828_v46 }
 0x65c   :  { %2564 = vmatpush1.bf16.msra.mxu0 %v3068_v55  ;;  %2596 = vmatpush1.bf16.msra.mxu1 %v3249_v54 }
 0x65d   :  { %2566 = vmatprep.subr.bf16.mxu0 %v3071_v56  ;;  %2598 = vmatprep.subr.bf16.mxu1 %v3252_v57 }
 0x660   :  { %2568 = vmatpush1.bf16.msra.mxu0 %v3096_v62  ;;  %2600 = vmatpush1.bf16.msra.mxu1 %v3261_v60 }
 0x661   :  { %2602 = vmatprep.subr.bf16.mxu0 %v2601_v12 }
 0x716   :  { %v1538_v18 = vpop.f32.mrb[12].mxu0  ;;  %v1609_v19 = vpop.f32.mrb[12].mxu1 }
 0x717   :  { %v2647_v25 = vadd.f32 %v1538_v18, %v3287_v11  ;;  %v1540_v26 = vpop.f32.mrb[13].mxu0  ;;  %v1611_v34 = vpop.f32.mrb[13].mxu1  ;;  %v2663_v55 = vadd.f32 %v1609_v19, %v3293_v43 }
 0x718   :  { %v2648_v35 = vadd.f32 %v1540_v26, %v3289_v13  ;;  %v2664_v48 = vadd.f32 %v1611_v34, %v3295_v45 }
 0x719   :  { %v2014_v41 = vmul.f32 -1.442695, %v2647_v25 }
 0x71a   :  { %v2015_v42 = vmul.f32 -1.442695, %v2648_v35  ;;  %v2016_v49 = vmul.f32 -1.442695, %v2664_v48 }
 0x71b   :  { %2796 = vpow2.f32 %v2014_v41 }
 0x71c   :  { %2798 = vpow2.f32 %v2015_v42 }
 0x71d   :  { %2800 = vpow2.f32 %v2016_v49 }
 0x71e   :  { %2802 = vtanh.f32 %v2663_v55 }
 0x725   :  { %v2797_v56 = vpop.eup %2796 }
 0x726   :  { %v2799_v62 = vpop.eup %2798  ;;  %v1621_v5 = vadd.f32 1.0, %v2797_v56 }
 0x727   :  { %v1627_v6 = vadd.f32 1.0, %v2799_v62  ;;  %v2801_v14 = vpop.eup %2800 }
 0x728   :  { %2804 = vrcp.f32 %v1621_v5  ;;  %v2803_v15 = vpop.eup %2802  ;;  %v1634_v31 = vadd.f32 1.0, %v2801_v14 }
 0x729   :  { %2806 = vrcp.f32 %v1627_v6 }
 0x72a   :  { %2808 = vrcp.f32 %v1634_v31 }
 0x732   :  { %v2805_v22 = vpop.eup %2804 }
 0x733   :  { %v2807_v23 = vpop.eup %2806  ;;  %v1638_v30 = vmul.f32 %v2805_v22, %v2803_v15 }
 0x734   :  { %v1637_v38 = vmul.f32 %v2807_v23, %v3529_v32  ;;  %v2809_v54 = vpop.eup %2808 }
 0x736   :  { %v3579_v39 = vadd.f32 %v1638_v30, %v1637_v38 }
 0x738   :  { %2810 = vtanh.f32 %v3579_v39 }
 0x742   :  { %v2811_v57 = vpop.eup %2810 }
 0x743   :  { %v1641_v60 = vmul.f32 %v2811_v57, %v2809_v54 }
 0x745   :  { %1712 = vmatmul.mubr.f32.vlgmr.msra.gmra.mrb[14].mxu0 %v1641_v60  ;;  %1783 = vmatmul.mubr.f32.vlgmr.msra.gmra.mrb[14].mxu1 %v1641_v60 }
 0x746   :  { %2604 = vmatpush3.bf16.msra.mxu0 %v2601_v12  ;;  %2077 = vmatprep.mubr.f32.mxu0 %v3302_v20  ;;  %v1835_v20 = vld [vmem:[%s3680_s4 + $0x48] sm:$0xff] }
 0x747   :  { %2606 = vmatprep.subr.bf16.mxu0 %v2605_v16  ;;  %v2617_v59 = vpack.c.bf16 %v1835_v20, %v1834_v58 }
 0x74a   :  { %2608 = vmatpush3.bf16.msra.mxu0 %v2605_v16 }
 0x74b   :  { %2610 = vmatprep.subr.bf16.mxu0 %v2609_v50 }
 0x74e   :  { %2612 = vmatpush3.bf16.msra.mxu0 %v2609_v50 }
 0x74f   :  { %2614 = vmatprep.subr.bf16.mxu0 %v2613_v53 }
 0x752   :  { %2616 = vmatpush3.bf16.msra.mxu0 %v2613_v53 }
 0x753   :  { %2618 = vmatprep.subr.bf16.mxu0 %v2617_v59 }
 0x756   :  { %2620 = vmatpush3.bf16.msra.mxu0 %v2617_v59 }
 0x757   :  { %2622 = vmatprep.subr.bf16.mxu0 %v2621_v63 }
 0x75a   :  { %2624 = vmatpush3.bf16.msra.mxu0 %v2621_v63 }
 0x75b   :  { %2626 = vmatprep.subr.bf16.mxu0 %v2625_v3 }
 0x75e   :  { %2628 = vmatpush3.bf16.msra.mxu0 %v2625_v3 }
 0x75f   :  { %2630 = vmatprep.subr.bf16.mxu0 %v2629_v7 }
 0x762   :  { %2632 = vmatpush3.bf16.msra.mxu0 %v2629_v7 }
 0x765   :  { %2078 = vmatmul.mubr.f32.vlgmr.msra.gmra.mrb[16].mxu0 %v3348_v21 }
 0x766   :  { %2080 = vmatprep.mubr.f32.mxu0 %v3394_v24 }
 0x769   :  { %2081 = vmatmul.mubr.f32.gmra.mrb[18].mxu0 %v3440_v28 }
 0x76a   :  { %2083 = vmatprep.mubr.f32.mxu0 %v3486_v33 }
 0x76d   :  { %2084 = vmatmul.mubr.f32.gmra.mrb[20].mxu0 %v3532_v37 }
 0x76e   :  { %2086 = vmatprep.mubr.f32.mxu0 %v1641_v60 }
 0x818   :  { %v1713_v27 = vpop.f32.mrb[14].mxu0  ;;  %v1784_v29 = vpop.f32.mrb[14].mxu1 }
 0x819   :  { %v2649_v32 = vadd.f32 %v1713_v27, %v3287_v11  ;;  %v1715_v10 = vpop.f32.mrb[15].mxu0  ;;  %v1786_v36 = vpop.f32.mrb[15].mxu1  ;;  %v2665_v28 = vadd.f32 %v1784_v29, %v3293_v43  ;;  %v2020_v43 = vld [vmem:[%s3681_s5] ss:$0 sm:$0xff] }
 0x81a   :  { %v2650_v1 = vadd.f32 %v1715_v10, %v3289_v13  ;;  %v2666_v21 = vadd.f32 %v1786_v36, %v3295_v45 }
 0x81b   :  { %v2017_v9 = vmul.f32 -1.442695, %v2649_v32 }
 0x81c   :  { %v2018_v12 = vmul.f32 -1.442695, %v2650_v1  ;;  %v2019_v24 = vmul.f32 -1.442695, %v2666_v21 }
 0x81d   :  { %2812 = vpow2.f32 %v2017_v9 }
 0x81e   :  { %2814 = vpow2.f32 %v2018_v12 }
 0x81f   :  { %2816 = vpow2.f32 %v2019_v24 }
 0x820   :  { %2818 = vtanh.f32 %v2665_v28 }
 0x827   :  { %v2813_v33 = vpop.eup %2812 }
 0x828   :  { %v2815_v37 = vpop.eup %2814  ;;  %v1796_v18 = vadd.f32 1.0, %v2813_v33 }
 0x829   :  { %v1802_v19 = vadd.f32 1.0, %v2815_v37  ;;  %v2817_v11 = vpop.eup %2816 }
 0x82a   :  { %2820 = vrcp.f32 %v1796_v18  ;;  %v2819_v25 = vpop.eup %2818  ;;  %v1809_v35 = vadd.f32 1.0, %v2817_v11 }
 0x82b   :  { %2822 = vrcp.f32 %v1802_v19 }
 0x82c   :  { %2824 = vrcp.f32 %v1809_v35 }
 0x834   :  { %v2821_v13 = vpop.eup %2820 }
 0x835   :  { %v2823_v26 = vpop.eup %2822  ;;  %v1813_v34 = vmul.f32 %v2821_v13, %v2819_v25 }
 0x836   :  { %v1812_v41 = vmul.f32 %v2823_v26, %v3579_v39  ;;  %v2825_v30 = vpop.eup %2824 }
 0x838   :  { %v2079_v45 = vpop.f32.mrb[16].mxu0  ;;  %v1814_v42 = vadd.f32 %v1813_v34, %v1812_v41 }
 0x839   :  { %v1921_v48 = vadd.f32 %v2079_v45, %v2020_v43  ;;  %v1915_v49 = vpop.f32.mrb[17].mxu0 }
 0x83a   :  { %v1916_v55 = vadd.f32 %v2020_v43, %v1915_v49  ;;  %2826 = vtanh.f32 %v1814_v42  ;;  %1963 = vst [vmem:[%s3682_s8] sm:$0xff] %v1814_v42 }
 0x83b   :  { %1955 = vst.msk [vmem:[%s3683_s6 + $0x8] sm:$0xff] %vm126_vm1, %v1921_v48 }
 0x83c   :  { %1954 = vst.msk [vmem:[%s3683_s6] sm:$0xff] %vm126_vm1, %v1916_v55  ;;  %v2082_v56 = vpop.f32.mrb[18].mxu0 }
 0x83d   :  { %v1931_v62 = vadd.f32 %v2082_v56, %v2020_v43  ;;  %v1925_v5 = vpop.f32.mrb[19].mxu0 }
 0x83e   :  { %v1926_v6 = vadd.f32 %v2020_v43, %v1925_v5 }
 0x83f   :  { %1957 = vst.msk [vmem:[%s3683_s6 + $0x18] sm:$0xff] %vm126_vm1, %v1931_v62 }
 0x840   :  { %1956 = vst.msk [vmem:[%s3683_s6 + $0x10] sm:$0xff] %vm126_vm1, %v1926_v6  ;;  %v2085_v14 = vpop.f32.mrb[20].mxu0 }
 0x841   :  { %v1941_v15 = vadd.f32 %v2085_v14, %v2020_v43  ;;  %v1935_v22 = vpop.f32.mrb[21].mxu0 }
 0x842   :  { %v1936_v23 = vadd.f32 %v2020_v43, %v1935_v22 }
 0x843   :  { %1959 = vst.msk [vmem:[%s3683_s6 + $0x28] sm:$0xff] %vm126_vm1, %v1941_v15 }
 0x844   :  { %v2827_v31 = vpop.eup %2826  ;;  %1958 = vst.msk [vmem:[%s3683_s6 + $0x20] sm:$0xff] %vm126_vm1, %v1936_v23 }
 0x845   :  { %v1816_v38 = vmul.f32 %v2827_v31, %v2825_v30 }
 0x847   :  { %2087 = vmatmul.mubr.f32.gmra.mrb[22].mxu0 %v1816_v38  ;;  %1962 = vst [vmem:[%s3684_s7] sm:$0xff] %v1816_v38 }
 0x91a   :  { %v2088_v39 = vpop.f32.mrb[22].mxu0 }
 0x91b   :  { %v1951_v46 = vadd.f32 %v2088_v39, %v2020_v43  ;;  %v1945_v47 = vpop.f32.mrb[23].mxu0 }
 0x91c   :  { %v1946_v54 = vadd.f32 %v2020_v43, %v1945_v47 }
 0x91d   :  { %1961 = vst.msk [vmem:[%s3683_s6 + $0x38] sm:$0xff] %vm126_vm1, %v1951_v46 }
 0x91e   :  { %1960 = vst.msk [vmem:[%s3683_s6 + $0x30] sm:$0xff] %vm126_vm1, %v1946_v54 }

</bundles_post_ra>
